<compile_context>
chip_gen: v6e
topology: v6e:2x2x1
jax: 0.10.0
libtpu: 0.0.40
codegen_flags: <defaults>
</compile_context>

<pallas_src>
import functools

import jax
import jax.numpy as jnp
from jax.experimental import pallas as pl
from jax.experimental.pallas import tpu as pltpu


def _round_up(v, m):
    return (v + m - 1) // m * m


def _pick_group_size(n, max_nb):
    """Largest divisor of n that is <= max_nb while keeping >= 2 grid steps."""
    best = 1
    for d in range(1, min(max_nb, n) + 1):
        if n % d == 0 and n // d >= min(2, n):
            best = d
    return best


# ------------------------------ Pallas kernel -------------------------------

def _inception_kernel(xp_ref, mask_ref, w1_ref, b1_ref, w3_ref, b3_ref,
                      w5_ref, b5_ref, wpool_ref, b4_ref, o_ref, ext_ref, *,
                      wgrid, margin, cinp, ch1, ch3rp, ch3, ch5rp, ch5, cpool):
    # xp_ref  : (1, cinp, lanes)  bf16, Nb images' padded pixel grids on lanes
    # mask_ref: (1, lanes)        f32, 1.0 on interior (original HxW) pixels
    # o_ref   : (1, cout, lanes)  f32, concatenated branch outputs
    # ext_ref : (cmax, lanes+2*margin) f32 scratch for lane-shifted conv/pool taps
    lanes = o_ref.shape[-1]

    # Zero the shift-scratch once; the margins are never written afterwards so
    # the pad-ring columns of the output stay deterministic (no stale VMEM).
    @pl.when(pl.program_id(0) == 0)
    def _init_scratch():
        ext_ref[...] = jnp.zeros_like(ext_ref)

    x = xp_ref[0]                                  # (cinp, lanes) bf16
    keep = mask_ref[...] > 0.0                     # (1, lanes) bool

    # ---- branch1 + both 1x1 "reduce" convs, batched into one MXU matmul ----
    y = jnp.dot(w1_ref[...], x, preferred_element_type=jnp.float32)
    y = jnp.maximum(y + b1_ref[...], 0.0)          # (ch1+ch3rp+ch5rp, lanes)
    o_ref[0, 0:ch1, :] = y[0:ch1]
    red3 = jnp.where(keep, y[ch1:ch1 + ch3rp], 0.0)            # true zero-pad
    red5 = jnp.where(keep, y[ch1 + ch3rp:ch1 + ch3rp + ch5rp], 0.0)

    def conv_same(a, w_ref, b_ref, k, crp):
        # 'same' KxK conv as ONE im2col matmul: k*k lane-shifted taps stacked
        # along the contraction axis (tap-major), cast to bf16 once, one dot.
        r = k // 2
        ext_ref[0:crp, margin:margin + lanes] = a
        taps = []
        for i in range(k):
            for j in range(k):
                s = margin + (i - r) * wgrid + (j - r)
                taps.append(ext_ref[0:crp, s:s + lanes])
        col = jnp.concatenate(taps, axis=0).astype(jnp.bfloat16)
        acc = jnp.dot(w_ref[...], col, preferred_element_type=jnp.float32)
        return jnp.maximum(acc + b_ref[...], 0.0)

    o_ref[0, ch1:ch1 + ch3, :] = conv_same(red3, w3_ref, b3_ref, 3, ch3rp)
    o_ref[0, ch1 + ch3:ch1 + ch3 + ch5, :] = conv_same(red5, w5_ref, b5_ref,
                                                       5, ch5rp)

    # ---- branch4: 3x3 / stride1 / pad1 max-pool (pad acts as -inf) + 1x1 ----
    big_neg = jnp.float32(-3.4e38)
    xneg = jnp.where(keep, x.astype(jnp.float32), big_neg)
    ext_ref[0:cinp, margin:margin + lanes] = xneg
    pooled = xneg                                   # centre tap: saves one max
    for i in range(3):
        for j in range(3):
            if i == 1 and j == 1:
                continue
            s = margin + (i - 1) * wgrid + (j - 1)
            pooled = jnp.maximum(pooled, ext_ref[0:cinp, s:s + lanes])
    pooled = jnp.where(keep, pooled, 0.0).astype(jnp.bfloat16)  # no -3.4e38 on MXU
    b4 = jnp.dot(wpool_ref[...], pooled, preferred_element_type=jnp.float32)
    c0 = ch1 + ch3 + ch5
    o_ref[0, c0:c0 + cpool, :] = jnp.maximum(b4 + b4_ref[...], 0.0)


# --------------------------------- wrapper ----------------------------------

def inception_forward(params, x_nchw, *, max_group=8):
    n, cin, h, w = x_nchw.shape
    pad = 2                                    # max padding needed (5x5 branch)
    hp, wp = h + 2 * pad, w + 2 * pad
    p = hp * wp
    pp = _round_up(p, 128)                     # lane-dense pixel axis
    margin = 2 * wp + 2                        # largest |tap shift| (5x5 conv)
    nb = _pick_group_size(n, max_group)        # images per grid step
    groups = n // nb
    lanes = nb * pp

    (w1, c1), (w2a, c2a), (w2b, c2b) = params["b1"], params["b2a"], params["b2b"]
    (w3a, c3a), (w3b, c3b), (w4, c4) = params["b3a"], params["b3b"], params["b4"]
    ch1, ch3r, ch3 = w1.shape[0], w2a.shape[0], w2b.shape[0]
    ch5r, ch5, cpool = w3a.shape[0], w3b.shape[0], w4.shape[0]
    cout = ch1 + ch3 + ch5 + cpool
    # Channel-sliced stores into the concatenated output stay sublane-aligned.
    assert all(c % 8 == 0 for c in (ch1, ch3, ch5, cpool)), (
        "branch output channel counts must be multiples of 8")

    cinp = _round_up(cin, 8)                   # zero-padded channel counts so
    ch3rp = _round_up(ch3r, 8)                 # every sublane slice/concat is
    ch5rp = _round_up(ch5r, 8)                 # 8-row aligned

    # Activations: channel-major, zero-padded pixel grid, pixels flat on lanes,
    # Nb images' slabs concatenated on the lane axis, shipped as bf16.
    xp = jnp.pad(x_nchw, ((0, 0), (0, cinp - cin), (pad, pad), (pad, pad)))
    xp = xp.reshape(n, cinp, p)
    xp = jnp.pad(xp, ((0, 0), (0, 0), (0, pp - p)))
    xp = xp.reshape(groups, nb, cinp, pp).transpose(0, 2, 1, 3)
    xp = xp.reshape(groups, cinp, lanes).astype(jnp.bfloat16)

    # 1.0 on pixels of the original HxW image, 0.0 on pad ring and lane tail.
    rows = (jnp.arange(hp) >= pad) & (jnp.arange(hp) < pad + h)
    cols = (jnp.arange(wp) >= pad) & (jnp.arange(wp) < pad + w)
    mask = (rows[:, None] & cols[None, :]).reshape(1, p).astype(jnp.float32)
    mask = jnp.pad(mask, ((0, 0), (0, pp - p)))
    mask = jnp.tile(mask, (1, nb))

    # ---- weights: MXU-friendly layouts, bf16, zero-padded channels ----------
    w2am = jnp.pad(w2a.reshape(ch3r, cin), ((0, ch3rp - ch3r), (0, 0)))
    w3am = jnp.pad(w3a.reshape(ch5r, cin), ((0, ch5rp - ch5r), (0, 0)))
    w1x1 = jnp.concatenate([w1.reshape(ch1, cin), w2am, w3am], axis=0)
    w1x1 = jnp.pad(w1x1, ((0, 0), (0, cinp - cin))).astype(jnp.bfloat16)
    bias1 = jnp.concatenate([c1, jnp.pad(c2a, (0, ch3rp - ch3r)),
                             jnp.pad(c3a, (0, ch5rp - ch5r))]).reshape(-1, 1)

    def kxk_weight(wk, crp):
        co, cr, k, _ = wk.shape
        wk = jnp.pad(wk, ((0, 0), (0, crp - cr), (0, 0), (0, 0)))
        # (O,I,H,W) -> (O,H,W,I) -> (O, K*K*Ipad): tap-major contraction axis
        # matching the im2col stacking order inside the kernel.
        return jnp.transpose(wk, (0, 2, 3, 1)).reshape(
            co, k * k * crp).astype(jnp.bfloat16)

    w3x3 = kxk_weight(w2b, ch3rp)
    w5x5 = kxk_weight(w3b, ch5rp)
    wpool = jnp.pad(w4.reshape(cpool, cin),
                    ((0, 0), (0, cinp - cin))).astype(jnp.bfloat16)

    kernel = functools.partial(
        _inception_kernel, wgrid=wp, margin=margin, cinp=cinp, ch1=ch1,
        ch3rp=ch3rp, ch3=ch3, ch5rp=ch5rp, ch5=ch5, cpool=cpool)

    def fixed(rank):
        return lambda g: (0,) * rank

    cmax = max(cinp, ch3rp, ch5rp)
    out_flat = pl.pallas_call(
        kernel,
        grid=(groups,),
        in_specs=[
            pl.BlockSpec((1, cinp, lanes), lambda g: (g, 0, 0)),
            pl.BlockSpec((1, lanes), fixed(2)),
            pl.BlockSpec(w1x1.shape, fixed(2)),
            pl.BlockSpec(bias1.shape, fixed(2)),
            pl.BlockSpec(w3x3.shape, fixed(2)),
            pl.BlockSpec((ch3, 1), fixed(2)),
            pl.BlockSpec(w5x5.shape, fixed(2)),
            pl.BlockSpec((ch5, 1), fixed(2)),
            pl.BlockSpec(wpool.shape, fixed(2)),
            pl.BlockSpec((cpool, 1), fixed(2)),
        ],
        out_specs=pl.BlockSpec((1, cout, lanes), lambda g: (g, 0, 0)),
        out_shape=jax.ShapeDtypeStruct((groups, cout, lanes), jnp.float32),
        scratch_shapes=[
            pltpu.VMEM((cmax, lanes + 2 * margin), jnp.float32)],
        # NOTE: at real Inception sizes, set vmem_limit_bytes and pick a
        # smaller Nb / H-tile for v7x (64 MiB VMEM) than for v5e/v6e (128 MiB).
        compiler_params=pltpu.CompilerParams(
            dimension_semantics=("parallel",)),
    )(xp, mask, w1x1, bias1, w3x3, c2b.reshape(ch3, 1), w5x5,
      c3b.reshape(ch5, 1), wpool, c4.reshape(cpool, 1))

    # Layout plumbing only: ungroup the batch, drop lane tail + pad ring, NCHW.
    out = out_flat.reshape(groups, cout, nb, pp).transpose(0, 2, 1, 3)
    out = out.reshape(n, cout, pp)[:, :, :p].reshape(n, cout, hp, wp)
    return out[:, :, pad:pad + h, pad:pad + w]


# -------------------------- parameter construction --------------------------

def _conv_params(key, cout, cin, k):
    """PyTorch default Conv2d init (uniform +/- 1/sqrt(fan_in))."""
    k1, k2 = jax.random.split(key)
    fan_in = cin * k * k
    bound = 1.0 / (fan_in ** 0.5)
    w = jax.random.uniform(k1, (cout, cin, k, k), jnp.float32, -bound, bound)
    b = jax.random.uniform(k2, (cout,), jnp.float32, -bound, bound)
    return w, b


def init_inception_params(key, in_channels, ch1, ch3reduce, ch3,
                          ch5reduce, ch5, pool_proj):
    keys = jax.random.split(key, 6)
    return {
        "b1":  _conv_params(keys[0], ch1,       in_channels, 1),
        "b2a": _conv_params(keys[1], ch3reduce, in_channels, 1),
        "b2b": _conv_params(keys[2], ch3,       ch3reduce,   3),
        "b3a": _conv_params(keys[3], ch5reduce, in_channels, 1),
        "b3b": _conv_params(keys[4], ch5,       ch5reduce,   5),
        "b4":  _conv_params(keys[5], pool_proj, in_channels, 1),
    }


# ----------------------------- pure-JAX reference ----------------------------

def _ref_conv_relu(x, w, b, padding):
    y = jax.lax.conv_general_dilated(
        x, w, window_strides=(1, 1), padding=[(padding, padding)] * 2,
        dimension_numbers=("NCHW", "OIHW", "NCHW"),
        precision=jax.lax.Precision.HIGHEST)
    return jnp.maximum(y + b[None, :, None, None], 0.0)


def inception_reference(params, x_nchw):
    x = x_nchw
    b1 = _ref_conv_relu(x, *params["b1"], 0)
    b2 = _ref_conv_relu(_ref_conv_relu(x, *params["b2a"], 0), *params["b2b"], 1)
    b3 = _ref_conv_relu(_ref_conv_relu(x, *params["b3a"], 0), *params["b3b"], 2)
    pooled = jax.lax.reduce_window(
        x, -jnp.inf, jax.lax.max, (1, 1, 3, 3), (1, 1, 1, 1),
        [(0, 0), (0, 0), (1, 1), (1, 1)])
    b4 = _ref_conv_relu(pooled, *params["b4"], 0)
    return jnp.concatenate([b1, b2, b3, b4], axis=1)


# ----------------------------------- main ------------------------------------

if __name__ == "__main__":
    key = jax.random.PRNGKey(0)
    k_params, k_x = jax.random.split(key)

    # Inception config: in=4, ch1=8, ch3red=4, ch3=8, ch5red=4, ch5=8, pool=8.
    params = init_inception_params(k_params, 4, 8, 4, 8, 4, 8, 8)
    x = jax.random.normal(k_x, (2, 4, 16, 16), dtype=jnp.float32)

    # Round params / input to bf16-representable f32 so the bf16-MXU kernel and
    # the f32 reference see identical inputs; tolerance then only covers the
    # kernel's bf16 rounding of in-VMEM intermediate activations.
    to_bf = lambda a: a.astype(jnp.bfloat16).astype(jnp.float32)
    params = jax.tree_util.tree_map(to_bf, params)
    x = to_bf(x)

    out = jax.jit(inception_forward)(params, x)
    out = jax.block_until_ready(out)

    ref = inception_reference(params, x)
    assert out.shape == (2, 32, 16, 16), out.shape
    max_err = float(jnp.max(jnp.abs(out - ref)))
    assert jnp.allclose(out, ref, atol=3e-2, rtol=3e-2), f"max abs err {max_err}"

    print("KERNEL_OK")
</pallas_src>

<mosaic_0001>
module attributes {stable_mosaic.version = 11 : i64} {
  func.func @_inception_kernel(%arg0: i32, %arg1: memref<1x8x512xbf16, #tpu.memory_space<vmem>>, %arg2: memref<1x512xf32, #tpu.memory_space<vmem>>, %arg3: memref<24x8xbf16, #tpu.memory_space<vmem>>, %arg4: memref<24x1xf32, #tpu.memory_space<vmem>>, %arg5: memref<8x72xbf16, #tpu.memory_space<vmem>>, %arg6: memref<8x1xf32, #tpu.memory_space<vmem>>, %arg7: memref<8x200xbf16, #tpu.memory_space<vmem>>, %arg8: memref<8x1xf32, #tpu.memory_space<vmem>>, %arg9: memref<8x8xbf16, #tpu.memory_space<vmem>>, %arg10: memref<8x1xf32, #tpu.memory_space<vmem>>, %arg11: memref<1x32x512xf32, #tpu.memory_space<vmem>>, %arg12: memref<8x596xf32, #tpu.memory_space<vmem>>) attributes {dimension_semantics = [#tpu.dimension_semantics<parallel>], iteration_bounds = array<i64: 2>, scalar_prefetch = 0 : i64, scratch_operands = 1 : i64, tpu.core_type = #tpu.core_type<tc>, window_params = [{transform_indices = @transform_0, window_bounds = array<i64: 1, 8, 512>}, {pipeline_mode = #tpu.pipeline_mode<synchronous>, transform_indices = @transform_1, window_bounds = array<i64: 1, 512>}, {pipeline_mode = #tpu.pipeline_mode<synchronous>, transform_indices = @transform_2, window_bounds = array<i64: 24, 8>}, {pipeline_mode = #tpu.pipeline_mode<synchronous>, transform_indices = @transform_3, window_bounds = array<i64: 24, 1>}, {pipeline_mode = #tpu.pipeline_mode<synchronous>, transform_indices = @transform_4, window_bounds = array<i64: 8, 72>}, {pipeline_mode = #tpu.pipeline_mode<synchronous>, transform_indices = @transform_5, window_bounds = array<i64: 8, 1>}, {pipeline_mode = #tpu.pipeline_mode<synchronous>, transform_indices = @transform_6, window_bounds = array<i64: 8, 200>}, {pipeline_mode = #tpu.pipeline_mode<synchronous>, transform_indices = @transform_7, window_bounds = array<i64: 8, 1>}, {pipeline_mode = #tpu.pipeline_mode<synchronous>, transform_indices = @transform_8, window_bounds = array<i64: 8, 8>}, {pipeline_mode = #tpu.pipeline_mode<synchronous>, transform_indices = @transform_9, window_bounds = array<i64: 8, 1>}, {transform_indices = @transform_10, window_bounds = array<i64: 1, 32, 512>}]} {
    %c0_i32 = arith.constant 0 : i32
    %0 = arith.cmpi eq, %arg0, %c0_i32 : i32
    %1 = arith.extui %0 : i1 to i32
    %c0_i32_0 = arith.constant 0 : i32
    %2 = arith.cmpi ne, %1, %c0_i32_0 : i32
    scf.if %2 {
      %cst_109 = arith.constant 0.000000e+00 : f32
      %128 = vector.broadcast %cst_109 : f32 to vector<8x596xf32>
      %c0_110 = arith.constant 0 : index
      %c0_111 = arith.constant 0 : index
      %129 = vector.load %arg12[%c0_110, %c0_111] : memref<8x596xf32, #tpu.memory_space<vmem>>, vector<8x596xf32>
      tpu.vector_store %arg12[%c0_110, %c0_111], %128 {strides = array<i32>} : memref<8x596xf32, #tpu.memory_space<vmem>>, vector<8x596xf32>,
    } else {
    }
    %c0 = arith.constant 0 : index
    %c0_1 = arith.constant 0 : index
    %c0_2 = arith.constant 0 : index
    %3 = vector.load %arg1[%c0, %c0_1, %c0_2] : memref<1x8x512xbf16, #tpu.memory_space<vmem>>, vector<1x8x512xbf16>
    %4 = vector.shape_cast %3 : vector<1x8x512xbf16> to vector<8x512xbf16>
    %c0_3 = arith.constant 0 : index
    %c0_4 = arith.constant 0 : index
    %5 = vector.load %arg2[%c0_3, %c0_4] : memref<1x512xf32, #tpu.memory_space<vmem>>, vector<1x512xf32>
    %cst = arith.constant 0.000000e+00 : f32
    %6 = vector.broadcast %cst : f32 to vector<1x512xf32>
    %7 = arith.cmpf ogt, %5, %6 : vector<1x512xf32>
    %c0_5 = arith.constant 0 : index
    %c0_6 = arith.constant 0 : index
    %8 = vector.load %arg3[%c0_5, %c0_6] : memref<24x8xbf16, #tpu.memory_space<vmem>>, vector<24x8xbf16>
    %cst_7 = arith.constant dense<0.000000e+00> : vector<24x512xf32>
    %9 = tpu.matmul %8, %4, %cst_7 {dimension_numbers = #tpu.dot_dimension_numbers<[1], [0], [0], [1], [0, 0, 1, 1], [], []>} : vector<24x8xbf16>, vector<8x512xbf16>, vector<24x512xf32> -> vector<24x512xf32>
    %c0_8 = arith.constant 0 : index
    %c0_9 = arith.constant 0 : index
    %10 = vector.load %arg4[%c0_8, %c0_9] : memref<24x1xf32, #tpu.memory_space<vmem>>, vector<24x1xf32>
    %11 = vector.broadcast %10 : vector<24x1xf32> to vector<24x512xf32>
    %12 = arith.addf %9, %11 : vector<24x512xf32>
    %cst_10 = arith.constant 0.000000e+00 : f32
    %13 = vector.broadcast %cst_10 : f32 to vector<24x512xf32>
    %14 = arith.maximumf %12, %13 : vector<24x512xf32>
    %15 = vector.extract_strided_slice %14 {offsets = [0, 0], sizes = [8, 512], strides = [1, 1]} : vector<24x512xf32> to vector<8x512xf32>
    %c0_11 = arith.constant 0 : index
    %c0_12 = arith.constant 0 : index
    %c0_13 = arith.constant 0 : index
    %16 = vector.load %arg11[%c0_11, %c0_12, %c0_13] : memref<1x32x512xf32, #tpu.memory_space<vmem>>, vector<1x8x512xf32>
    %17 = vector.shape_cast %16 : vector<1x8x512xf32> to vector<8x512xf32>
    %18 = vector.shape_cast %15 : vector<8x512xf32> to vector<1x8x512xf32>
    tpu.vector_store %arg11[%c0_11, %c0_12, %c0_13], %18 {strides = array<i32>} : memref<1x32x512xf32, #tpu.memory_space<vmem>>, vector<1x8x512xf32>,
    %19 = vector.extract_strided_slice %14 {offsets = [8, 0], sizes = [8, 512], strides = [1, 1]} : vector<24x512xf32> to vector<8x512xf32>
    %cst_14 = arith.constant 0.000000e+00 : f32
    %20 = vector.shape_cast %7 : vector<1x512xi1> to vector<1x512xi1>
    %21 = vector.broadcast %20 : vector<1x512xi1> to vector<8x512xi1>
    %22 = vector.broadcast %cst_14 : f32 to vector<8x512xf32>
    %23 = arith.select %21, %19, %22 : vector<8x512xi1>, vector<8x512xf32>
    %24 = vector.extract_strided_slice %14 {offsets = [16, 0], sizes = [8, 512], strides = [1, 1]} : vector<24x512xf32> to vector<8x512xf32>
    %cst_15 = arith.constant 0.000000e+00 : f32
    %25 = vector.shape_cast %7 : vector<1x512xi1> to vector<1x512xi1>
    %26 = vector.broadcast %25 : vector<1x512xi1> to vector<8x512xi1>
    %27 = vector.broadcast %cst_15 : f32 to vector<8x512xf32>
    %28 = arith.select %26, %24, %27 : vector<8x512xi1>, vector<8x512xf32>
    %c0_16 = arith.constant 0 : index
    %c42 = arith.constant 42 : index
    %29 = vector.load %arg12[%c0_16, %c42] : memref<8x596xf32, #tpu.memory_space<vmem>>, vector<8x512xf32>
    tpu.vector_store %arg12[%c0_16, %c42], %23 {strides = array<i32>} : memref<8x596xf32, #tpu.memory_space<vmem>>, vector<8x512xf32>,
    %c0_17 = arith.constant 0 : index
    %c21 = arith.constant 21 : index
    %30 = vector.load %arg12[%c0_17, %c21] : memref<8x596xf32, #tpu.memory_space<vmem>>, vector<8x512xf32>
    %c0_18 = arith.constant 0 : index
    %c22 = arith.constant 22 : index
    %31 = vector.load %arg12[%c0_18, %c22] : memref<8x596xf32, #tpu.memory_space<vmem>>, vector<8x512xf32>
    %c0_19 = arith.constant 0 : index
    %c23 = arith.constant 23 : index
    %32 = vector.load %arg12[%c0_19, %c23] : memref<8x596xf32, #tpu.memory_space<vmem>>, vector<8x512xf32>
    %c0_20 = arith.constant 0 : index
    %c41 = arith.constant 41 : index
    %33 = vector.load %arg12[%c0_20, %c41] : memref<8x596xf32, #tpu.memory_space<vmem>>, vector<8x512xf32>
    %c0_21 = arith.constant 0 : index
    %c42_22 = arith.constant 42 : index
    %34 = vector.load %arg12[%c0_21, %c42_22] : memref<8x596xf32, #tpu.memory_space<vmem>>, vector<8x512xf32>
    %c0_23 = arith.constant 0 : index
    %c43 = arith.constant 43 : index
    %35 = vector.load %arg12[%c0_23, %c43] : memref<8x596xf32, #tpu.memory_space<vmem>>, vector<8x512xf32>
    %c0_24 = arith.constant 0 : index
    %c61 = arith.constant 61 : index
    %36 = vector.load %arg12[%c0_24, %c61] : memref<8x596xf32, #tpu.memory_space<vmem>>, vector<8x512xf32>
    %c0_25 = arith.constant 0 : index
    %c62 = arith.constant 62 : index
    %37 = vector.load %arg12[%c0_25, %c62] : memref<8x596xf32, #tpu.memory_space<vmem>>, vector<8x512xf32>
    %c0_26 = arith.constant 0 : index
    %c63 = arith.constant 63 : index
    %38 = vector.load %arg12[%c0_26, %c63] : memref<8x596xf32, #tpu.memory_space<vmem>>, vector<8x512xf32>
    %39 = tpu.concatenate %30, %31, %32, %33, %34, %35, %36, %37, %38 in 0 : vector<8x512xf32>, vector<8x512xf32>, vector<8x512xf32>, vector<8x512xf32>, vector<8x512xf32>, vector<8x512xf32>, vector<8x512xf32>, vector<8x512xf32>, vector<8x512xf32> -> vector<72x512xf32>
    %40 = arith.truncf %39 : vector<72x512xf32> to vector<72x512xbf16>
    %c0_27 = arith.constant 0 : index
    %c0_28 = arith.constant 0 : index
    %41 = vector.load %arg5[%c0_27, %c0_28] : memref<8x72xbf16, #tpu.memory_space<vmem>>, vector<8x72xbf16>
    %cst_29 = arith.constant dense<0.000000e+00> : vector<8x512xf32>
    %42 = tpu.matmul %41, %40, %cst_29 {dimension_numbers = #tpu.dot_dimension_numbers<[1], [0], [0], [1], [0, 0, 1, 1], [], []>} : vector<8x72xbf16>, vector<72x512xbf16>, vector<8x512xf32> -> vector<8x512xf32>
    %c0_30 = arith.constant 0 : index
    %c0_31 = arith.constant 0 : index
    %43 = vector.load %arg6[%c0_30, %c0_31] : memref<8x1xf32, #tpu.memory_space<vmem>>, vector<8x1xf32>
    %44 = vector.broadcast %43 : vector<8x1xf32> to vector<8x512xf32>
    %45 = arith.addf %42, %44 : vector<8x512xf32>
    %cst_32 = arith.constant 0.000000e+00 : f32
    %46 = vector.broadcast %cst_32 : f32 to vector<8x512xf32>
    %47 = arith.maximumf %45, %46 : vector<8x512xf32>
    %c0_33 = arith.constant 0 : index
    %c8 = arith.constant 8 : index
    %c0_34 = arith.constant 0 : index
    %48 = vector.load %arg11[%c0_33, %c8, %c0_34] : memref<1x32x512xf32, #tpu.memory_space<vmem>>, vector<1x8x512xf32>
    %49 = vector.shape_cast %48 : vector<1x8x512xf32> to vector<8x512xf32>
    %50 = vector.shape_cast %47 : vector<8x512xf32> to vector<1x8x512xf32>
    tpu.vector_store %arg11[%c0_33, %c8, %c0_34], %50 {strides = array<i32>} : memref<1x32x512xf32, #tpu.memory_space<vmem>>, vector<1x8x512xf32>,
    %c0_35 = arith.constant 0 : index
    %c42_36 = arith.constant 42 : index
    %51 = vector.load %arg12[%c0_35, %c42_36] : memref<8x596xf32, #tpu.memory_space<vmem>>, vector<8x512xf32>
    tpu.vector_store %arg12[%c0_35, %c42_36], %28 {strides = array<i32>} : memref<8x596xf32, #tpu.memory_space<vmem>>, vector<8x512xf32>,
    %c0_37 = arith.constant 0 : index
    %c0_38 = arith.constant 0 : index
    %52 = vector.load %arg12[%c0_37, %c0_38] : memref<8x596xf32, #tpu.memory_space<vmem>>, vector<8x512xf32>
    %c0_39 = arith.constant 0 : index
    %c1 = arith.constant 1 : index
    %53 = vector.load %arg12[%c0_39, %c1] : memref<8x596xf32, #tpu.memory_space<vmem>>, vector<8x512xf32>
    %c0_40 = arith.constant 0 : index
    %c2 = arith.constant 2 : index
    %54 = vector.load %arg12[%c0_40, %c2] : memref<8x596xf32, #tpu.memory_space<vmem>>, vector<8x512xf32>
    %c0_41 = arith.constant 0 : index
    %c3 = arith.constant 3 : index
    %55 = vector.load %arg12[%c0_41, %c3] : memref<8x596xf32, #tpu.memory_space<vmem>>, vector<8x512xf32>
    %c0_42 = arith.constant 0 : index
    %c4 = arith.constant 4 : index
    %56 = vector.load %arg12[%c0_42, %c4] : memref<8x596xf32, #tpu.memory_space<vmem>>, vector<8x512xf32>
    %c0_43 = arith.constant 0 : index
    %c20 = arith.constant 20 : index
    %57 = vector.load %arg12[%c0_43, %c20] : memref<8x596xf32, #tpu.memory_space<vmem>>, vector<8x512xf32>
    %c0_44 = arith.constant 0 : index
    %c21_45 = arith.constant 21 : index
    %58 = vector.load %arg12[%c0_44, %c21_45] : memref<8x596xf32, #tpu.memory_space<vmem>>, vector<8x512xf32>
    %c0_46 = arith.constant 0 : index
    %c22_47 = arith.constant 22 : index
    %59 = vector.load %arg12[%c0_46, %c22_47] : memref<8x596xf32, #tpu.memory_space<vmem>>, vector<8x512xf32>
    %c0_48 = arith.constant 0 : index
    %c23_49 = arith.constant 23 : index
    %60 = vector.load %arg12[%c0_48, %c23_49] : memref<8x596xf32, #tpu.memory_space<vmem>>, vector<8x512xf32>
    %c0_50 = arith.constant 0 : index
    %c24 = arith.constant 24 : index
    %61 = vector.load %arg12[%c0_50, %c24] : memref<8x596xf32, #tpu.memory_space<vmem>>, vector<8x512xf32>
    %c0_51 = arith.constant 0 : index
    %c40 = arith.constant 40 : index
    %62 = vector.load %arg12[%c0_51, %c40] : memref<8x596xf32, #tpu.memory_space<vmem>>, vector<8x512xf32>
    %c0_52 = arith.constant 0 : index
    %c41_53 = arith.constant 41 : index
    %63 = vector.load %arg12[%c0_52, %c41_53] : memref<8x596xf32, #tpu.memory_space<vmem>>, vector<8x512xf32>
    %c0_54 = arith.constant 0 : index
    %c42_55 = arith.constant 42 : index
    %64 = vector.load %arg12[%c0_54, %c42_55] : memref<8x596xf32, #tpu.memory_space<vmem>>, vector<8x512xf32>
    %c0_56 = arith.constant 0 : index
    %c43_57 = arith.constant 43 : index
    %65 = vector.load %arg12[%c0_56, %c43_57] : memref<8x596xf32, #tpu.memory_space<vmem>>, vector<8x512xf32>
    %c0_58 = arith.constant 0 : index
    %c44 = arith.constant 44 : index
    %66 = vector.load %arg12[%c0_58, %c44] : memref<8x596xf32, #tpu.memory_space<vmem>>, vector<8x512xf32>
    %c0_59 = arith.constant 0 : index
    %c60 = arith.constant 60 : index
    %67 = vector.load %arg12[%c0_59, %c60] : memref<8x596xf32, #tpu.memory_space<vmem>>, vector<8x512xf32>
    %c0_60 = arith.constant 0 : index
    %c61_61 = arith.constant 61 : index
    %68 = vector.load %arg12[%c0_60, %c61_61] : memref<8x596xf32, #tpu.memory_space<vmem>>, vector<8x512xf32>
    %c0_62 = arith.constant 0 : index
    %c62_63 = arith.constant 62 : index
    %69 = vector.load %arg12[%c0_62, %c62_63] : memref<8x596xf32, #tpu.memory_space<vmem>>, vector<8x512xf32>
    %c0_64 = arith.constant 0 : index
    %c63_65 = arith.constant 63 : index
    %70 = vector.load %arg12[%c0_64, %c63_65] : memref<8x596xf32, #tpu.memory_space<vmem>>, vector<8x512xf32>
    %c0_66 = arith.constant 0 : index
    %c64 = arith.constant 64 : index
    %71 = vector.load %arg12[%c0_66, %c64] : memref<8x596xf32, #tpu.memory_space<vmem>>, vector<8x512xf32>
    %c0_67 = arith.constant 0 : index
    %c80 = arith.constant 80 : index
    %72 = vector.load %arg12[%c0_67, %c80] : memref<8x596xf32, #tpu.memory_space<vmem>>, vector<8x512xf32>
    %c0_68 = arith.constant 0 : index
    %c81 = arith.constant 81 : index
    %73 = vector.load %arg12[%c0_68, %c81] : memref<8x596xf32, #tpu.memory_space<vmem>>, vector<8x512xf32>
    %c0_69 = arith.constant 0 : index
    %c82 = arith.constant 82 : index
    %74 = vector.load %arg12[%c0_69, %c82] : memref<8x596xf32, #tpu.memory_space<vmem>>, vector<8x512xf32>
    %c0_70 = arith.constant 0 : index
    %c83 = arith.constant 83 : index
    %75 = vector.load %arg12[%c0_70, %c83] : memref<8x596xf32, #tpu.memory_space<vmem>>, vector<8x512xf32>
    %c0_71 = arith.constant 0 : index
    %c84 = arith.constant 84 : index
    %76 = vector.load %arg12[%c0_71, %c84] : memref<8x596xf32, #tpu.memory_space<vmem>>, vector<8x512xf32>
    %77 = tpu.concatenate %52, %53, %54, %55, %56, %57, %58, %59, %60, %61, %62, %63, %64, %65, %66, %67 in 0 : vector<8x512xf32>, vector<8x512xf32>, vector<8x512xf32>, vector<8x512xf32>, vector<8x512xf32>, vector<8x512xf32>, vector<8x512xf32>, vector<8x512xf32>, vector<8x512xf32>, vector<8x512xf32>, vector<8x512xf32>, vector<8x512xf32>, vector<8x512xf32>, vector<8x512xf32>, vector<8x512xf32>, vector<8x512xf32> -> vector<128x512xf32>
    %78 = tpu.concatenate %68, %69, %70, %71, %72, %73, %74, %75, %76 in 0 : vector<8x512xf32>, vector<8x512xf32>, vector<8x512xf32>, vector<8x512xf32>, vector<8x512xf32>, vector<8x512xf32>, vector<8x512xf32>, vector<8x512xf32>, vector<8x512xf32> -> vector<72x512xf32>
    %79 = tpu.concatenate %77, %78 in 0 : vector<128x512xf32>, vector<72x512xf32> -> vector<200x512xf32>
    %80 = arith.truncf %79 : vector<200x512xf32> to vector<200x512xbf16>
    %c0_72 = arith.constant 0 : index
    %c0_73 = arith.constant 0 : index
    %81 = vector.load %arg7[%c0_72, %c0_73] : memref<8x200xbf16, #tpu.memory_space<vmem>>, vector<8x200xbf16>
    %cst_74 = arith.constant dense<0.000000e+00> : vector<8x512xf32>
    %82 = tpu.matmul %81, %80, %cst_74 {dimension_numbers = #tpu.dot_dimension_numbers<[1], [0], [0], [1], [0, 0, 1, 1], [], []>} : vector<8x200xbf16>, vector<200x512xbf16>, vector<8x512xf32> -> vector<8x512xf32>
    %c0_75 = arith.constant 0 : index
    %c0_76 = arith.constant 0 : index
    %83 = vector.load %arg8[%c0_75, %c0_76] : memref<8x1xf32, #tpu.memory_space<vmem>>, vector<8x1xf32>
    %84 = vector.broadcast %83 : vector<8x1xf32> to vector<8x512xf32>
    %85 = arith.addf %82, %84 : vector<8x512xf32>
    %cst_77 = arith.constant 0.000000e+00 : f32
    %86 = vector.broadcast %cst_77 : f32 to vector<8x512xf32>
    %87 = arith.maximumf %85, %86 : vector<8x512xf32>
    %c0_78 = arith.constant 0 : index
    %c16 = arith.constant 16 : index
    %c0_79 = arith.constant 0 : index
    %88 = vector.load %arg11[%c0_78, %c16, %c0_79] : memref<1x32x512xf32, #tpu.memory_space<vmem>>, vector<1x8x512xf32>
    %89 = vector.shape_cast %88 : vector<1x8x512xf32> to vector<8x512xf32>
    %90 = vector.shape_cast %87 : vector<8x512xf32> to vector<1x8x512xf32>
    tpu.vector_store %arg11[%c0_78, %c16, %c0_79], %90 {strides = array<i32>} : memref<1x32x512xf32, #tpu.memory_space<vmem>>, vector<1x8x512xf32>,
    %91 = arith.extf %4 : vector<8x512xbf16> to vector<8x512xf32>
    %cst_80 = arith.constant -3.400000e+38 : f32
    %92 = vector.shape_cast %7 : vector<1x512xi1> to vector<1x512xi1>
    %93 = vector.broadcast %92 : vector<1x512xi1> to vector<8x512xi1>
    %94 = vector.broadcast %cst_80 : f32 to vector<8x512xf32>
    %95 = arith.select %93, %91, %94 : vector<8x512xi1>, vector<8x512xf32>
    %c0_81 = arith.constant 0 : index
    %c42_82 = arith.constant 42 : index
    %96 = vector.load %arg12[%c0_81, %c42_82] : memref<8x596xf32, #tpu.memory_space<vmem>>, vector<8x512xf32>
    tpu.vector_store %arg12[%c0_81, %c42_82], %95 {strides = array<i32>} : memref<8x596xf32, #tpu.memory_space<vmem>>, vector<8x512xf32>,
    %c0_83 = arith.constant 0 : index
    %c21_84 = arith.constant 21 : index
    %97 = vector.load %arg12[%c0_83, %c21_84] : memref<8x596xf32, #tpu.memory_space<vmem>>, vector<8x512xf32>
    %98 = arith.maximumf %95, %97 : vector<8x512xf32>
    %c0_85 = arith.constant 0 : index
    %c22_86 = arith.constant 22 : index
    %99 = vector.load %arg12[%c0_85, %c22_86] : memref<8x596xf32, #tpu.memory_space<vmem>>, vector<8x512xf32>
    %100 = arith.maximumf %98, %99 : vector<8x512xf32>
    %c0_87 = arith.constant 0 : index
    %c23_88 = arith.constant 23 : index
    %101 = vector.load %arg12[%c0_87, %c23_88] : memref<8x596xf32, #tpu.memory_space<vmem>>, vector<8x512xf32>
    %102 = arith.maximumf %100, %101 : vector<8x512xf32>
    %c0_89 = arith.constant 0 : index
    %c41_90 = arith.constant 41 : index
    %103 = vector.load %arg12[%c0_89, %c41_90] : memref<8x596xf32, #tpu.memory_space<vmem>>, vector<8x512xf32>
    %104 = arith.maximumf %102, %103 : vector<8x512xf32>
    %c0_91 = arith.constant 0 : index
    %c43_92 = arith.constant 43 : index
    %105 = vector.load %arg12[%c0_91, %c43_92] : memref<8x596xf32, #tpu.memory_space<vmem>>, vector<8x512xf32>
    %106 = arith.maximumf %104, %105 : vector<8x512xf32>
    %c0_93 = arith.constant 0 : index
    %c61_94 = arith.constant 61 : index
    %107 = vector.load %arg12[%c0_93, %c61_94] : memref<8x596xf32, #tpu.memory_space<vmem>>, vector<8x512xf32>
    %108 = arith.maximumf %106, %107 : vector<8x512xf32>
    %c0_95 = arith.constant 0 : index
    %c62_96 = arith.constant 62 : index
    %109 = vector.load %arg12[%c0_95, %c62_96] : memref<8x596xf32, #tpu.memory_space<vmem>>, vector<8x512xf32>
    %110 = arith.maximumf %108, %109 : vector<8x512xf32>
    %c0_97 = arith.constant 0 : index
    %c63_98 = arith.constant 63 : index
    %111 = vector.load %arg12[%c0_97, %c63_98] : memref<8x596xf32, #tpu.memory_space<vmem>>, vector<8x512xf32>
    %112 = arith.maximumf %110, %111 : vector<8x512xf32>
    %cst_99 = arith.constant 0.000000e+00 : f32
    %113 = vector.shape_cast %7 : vector<1x512xi1> to vector<1x512xi1>
    %114 = vector.broadcast %113 : vector<1x512xi1> to vector<8x512xi1>
    %115 = vector.broadcast %cst_99 : f32 to vector<8x512xf32>
    %116 = arith.select %114, %112, %115 : vector<8x512xi1>, vector<8x512xf32>
    %117 = arith.truncf %116 : vector<8x512xf32> to vector<8x512xbf16>
    %c0_100 = arith.constant 0 : index
    %c0_101 = arith.constant 0 : index
    %118 = vector.load %arg9[%c0_100, %c0_101] : memref<8x8xbf16, #tpu.memory_space<vmem>>, vector<8x8xbf16>
    %cst_102 = arith.constant dense<0.000000e+00> : vector<8x512xf32>
    %119 = tpu.matmul %118, %117, %cst_102 {dimension_numbers = #tpu.dot_dimension_numbers<[1], [0], [0], [1], [0, 0, 1, 1], [], []>} : vector<8x8xbf16>, vector<8x512xbf16>, vector<8x512xf32> -> vector<8x512xf32>
    %c0_103 = arith.constant 0 : index
    %c0_104 = arith.constant 0 : index
    %120 = vector.load %arg10[%c0_103, %c0_104] : memref<8x1xf32, #tpu.memory_space<vmem>>, vector<8x1xf32>
    %121 = vector.broadcast %120 : vector<8x1xf32> to vector<8x512xf32>
    %122 = arith.addf %119, %121 : vector<8x512xf32>
    %cst_105 = arith.constant 0.000000e+00 : f32
    %123 = vector.broadcast %cst_105 : f32 to vector<8x512xf32>
    %124 = arith.maximumf %122, %123 : vector<8x512xf32>
    %c0_106 = arith.constant 0 : index
    %c24_107 = arith.constant 24 : index
    %c0_108 = arith.constant 0 : index
    %125 = vector.load %arg11[%c0_106, %c24_107, %c0_108] : memref<1x32x512xf32, #tpu.memory_space<vmem>>, vector<1x8x512xf32>
    %126 = vector.shape_cast %125 : vector<1x8x512xf32> to vector<8x512xf32>
    %127 = vector.shape_cast %124 : vector<8x512xf32> to vector<1x8x512xf32>
    tpu.vector_store %arg11[%c0_106, %c24_107, %c0_108], %127 {strides = array<i32>} : memref<1x32x512xf32, #tpu.memory_space<vmem>>, vector<1x8x512xf32>,
    return
  }
  func.func @transform_0(%arg0: i32) -> (i32, i32, i32) {
    %c0_i32 = arith.constant 0 : i32
    %c0_i32_0 = arith.constant 0 : i32
    %c0_i32_1 = arith.constant 0 : i32
    return %arg0, %c0_i32, %c0_i32_0 : i32, i32, i32
  }
  func.func @transform_1(%arg0: i32) -> (i32, i32) {
    %c0_i32 = arith.constant 0 : i32
    %c0_i32_0 = arith.constant 0 : i32
    %c0_i32_1 = arith.constant 0 : i32
    return %c0_i32, %c0_i32_0 : i32, i32
  }
  func.func @transform_2(%arg0: i32) -> (i32, i32) {
    %c0_i32 = arith.constant 0 : i32
    %c0_i32_0 = arith.constant 0 : i32
    %c0_i32_1 = arith.constant 0 : i32
    return %c0_i32, %c0_i32_0 : i32, i32
  }
  func.func @transform_3(%arg0: i32) -> (i32, i32) {
    %c0_i32 = arith.constant 0 : i32
    %c0_i32_0 = arith.constant 0 : i32
    %c0_i32_1 = arith.constant 0 : i32
    return %c0_i32, %c0_i32_0 : i32, i32
  }
  func.func @transform_4(%arg0: i32) -> (i32, i32) {
    %c0_i32 = arith.constant 0 : i32
    %c0_i32_0 = arith.constant 0 : i32
    %c0_i32_1 = arith.constant 0 : i32
    return %c0_i32, %c0_i32_0 : i32, i32
  }
  func.func @transform_5(%arg0: i32) -> (i32, i32) {
    %c0_i32 = arith.constant 0 : i32
    %c0_i32_0 = arith.constant 0 : i32
    %c0_i32_1 = arith.constant 0 : i32
    return %c0_i32, %c0_i32_0 : i32, i32
  }
  func.func @transform_6(%arg0: i32) -> (i32, i32) {
    %c0_i32 = arith.constant 0 : i32
    %c0_i32_0 = arith.constant 0 : i32
    %c0_i32_1 = arith.constant 0 : i32
    return %c0_i32, %c0_i32_0 : i32, i32
  }
  func.func @transform_7(%arg0: i32) -> (i32, i32) {
    %c0_i32 = arith.constant 0 : i32
    %c0_i32_0 = arith.constant 0 : i32
    %c0_i32_1 = arith.constant 0 : i32
    return %c0_i32, %c0_i32_0 : i32, i32
  }
  func.func @transform_8(%arg0: i32) -> (i32, i32) {
    %c0_i32 = arith.constant 0 : i32
    %c0_i32_0 = arith.constant 0 : i32
    %c0_i32_1 = arith.constant 0 : i32
    return %c0_i32, %c0_i32_0 : i32, i32
  }
  func.func @transform_9(%arg0: i32) -> (i32, i32) {
    %c0_i32 = arith.constant 0 : i32
    %c0_i32_0 = arith.constant 0 : i32
    %c0_i32_1 = arith.constant 0 : i32
    return %c0_i32, %c0_i32_0 : i32, i32
  }
  func.func @transform_10(%arg0: i32) -> (i32, i32, i32) {
    %c0_i32 = arith.constant 0 : i32
    %c0_i32_0 = arith.constant 0 : i32
    %c0_i32_1 = arith.constant 0 : i32
    return %arg0, %c0_i32, %c0_i32_0 : i32, i32, i32
  }
}

</mosaic_0001>

<bundles_post_ra>
// kernel: inception_forward.1
= control target key start
LH: loop header
LB: loop body
LE: loop exit
PB: predicated region body
PF: predicated region fallthrough
CT: control target
= control target key end

     0   :  { %s2715_s13 = smov 0   ;;  %s4315_s0 = inlined_call_operand.vmem [shape: bf16[2,8,512], index: 0, kind: input, shape index: {}]   ;;  %s4316_s1 = inlined_call_operand.vmem [shape: f32[1,512], index: 1, kind: input, shape index: {}]   ;;  %s4317_s2 = inlined_call_operand.vmem [shape: bf16[24,8], index: 2, kind: input, shape index: {}]   ;;  %s4318_s3 = inlined_call_operand.vmem [shape: f32[24,1], index: 3, kind: input, shape index: {}]   ;;  %s4319_s4 = inlined_call_operand.vmem [shape: bf16[8,72], index: 4, kind: input, shape index: {}]   ;;  %s4320_s5 = inlined_call_operand.vmem [shape: f32[8,1], index: 5, kind: input, shape index: {}]   ;;  %s4321_s6 = inlined_call_operand.vmem [shape: bf16[8,200], index: 6, kind: input, shape index: {}]   ;;  %s4322_s7 = inlined_call_operand.vmem [shape: f32[8,1], index: 7, kind: input, shape index: {}]   ;;  %s4323_s8 = inlined_call_operand.vmem [shape: bf16[8,8], index: 8, kind: input, shape index: {}]   ;;  %s4324_s9 = inlined_call_operand.vmem [shape: f32[8,1], index: 9, kind: input, shape index: {}]   ;;  %s4325_s10 = inlined_call_operand.vmem [shape: f32[2,32,512], index: 10, kind: output, shape index: {}]  }
   0x1 LB: > { %s2084_s14 = sadd.s32 4294967295, %s2636_s13   ;;  %p2088_p0 = scmp.ge.s32.totalorder %s2636_s13, 1  ;;  %s2636_s13 = sphi %s2715_s13, %s20_s13  }
   0x2   : > { %p312_p1 = scmp.lt.s32.totalorder %s2636_s13, 3 }
   0x4   : > { %p313_p2 = pnand %p2088_p0, %p312_p1 }
   0x6   : > { %316 = sbr.rel (%p313_p2) target bundleno = 990 (0x3de), region = 60 }
   0xb   : > { %p350_p3 = scmp.lt.s32.totalorder %s2084_s14, 1  ;;  %p2093_p4 = scmp.ne.s32.totalorder %s2084_s14, 0 }
   0xd   : > { %s351_s15 = scalar_select %p350_p3, %s2084_s14, 1 }
   0xe   : > { %364 = sbr.rel (%p2093_p4) target bundleno = 22 (0x16), region = 64 }
   0xf   : > { %s2122_s16 = sshll.u32 %s351_s15, 4  ;;  %s2123_s17 = sshll.u32 %s351_s15, 7 }
  0x10   : > { %s354_s20 = scalar_lea.vmem %s4315_s0, %s2122_s16  ;;  %s2729_s23 = scalar_lea.vmem %s4325_s10, %s2123_s17 }
  0x13   : > { %vm369_vm0 = vcmask 687104   ;;  %v2638_v0 = vmov 0.0  }
  0x14   : > { %365 = vst [vmem:[#allocation2] sm:$0xff] %v2638_v0  ;;  %366 = vst [vmem:[#allocation2 + $0x8] sm:$0xff] %v2638_v0 }
  0x15   : > { %370 = vst.msk [vmem:[#allocation2 + $0x20] sm:$0xff] %vm369_vm0, %v2638_v0 }
  0x16 PF: > { %v371_v1 = vld [vmem:[%s354_s20] sm:$0xff]  ;;  %vm421_vm1 = vcmask 1043456   ;;  %v2731_v2 = vld [vmem:[%s354_s20 + $0x8] sm:$0xff]  ;;  %v4326_v7 = vmov 0   ;;  %v380_v12 = vld [vmem:[%s4318_s3 + $0x10] sm:$0xff]  ;;  %vm4373_vm2 = vcmask 64512   ;;  %v553_v16 = vlaneseq }
  0x17   : > { %v2097_v3 = vcombine.high %v371_v1, %v371_v1  ;;  %v2099_v4 = vcombine.high %v2731_v2, %v2731_v2  ;;  %v2096_v5 = vcombine.low %v371_v1, %v371_v1  ;;  %v2098_v6 = vcombine.low %v2731_v2, %v2731_v2  ;;  %466 = vmatprep.mubr.bf16.mxu0 %v4326_v7  ;;  %v379_v8 = vld [vmem:[%s4318_s3 + $0x8] sm:$0xff]  ;;  %v2625_v11 = vld [vmem:[%s4317_s2] sm:$0xff]   ;;  %s2640_s19 = smov 42   ;;  %s2641_s20 = smov 126  }
  0x18   : > { %517 = vmatprep.mubr.bf16.mxu1 %v4326_v7  ;;  %2154 = vset.pattern.permute.xlu0 %v4326_v7  ;;  %v378_v13 = vld [vmem:[%s4318_s3] sm:$0xff]  ;;  %v2626_v15 = vld [vmem:[%s4317_s2 + $0x8] ss:$0 sps:$4 sm:$0xff]   ;;  %v554_v17 = vshrl.u32 %v553_v16, 7  ;;  %v1688_v23 = vunpack.c.l.bf16 %v371_v1  ;;  %v1689_v26 = vunpack.c.h.bf16 %v371_v1  ;;  %v1690_v31 = vunpack.c.l.bf16 %v2731_v2  ;;  %s2642_s21 = smov 127   ;;  %s2643_s22 = smov 107  }
  0x19   : > { %2100 = vmatprep.subr.msk.bf16.mxu0 %vm421_vm1, %v2097_v3  ;;  %2103 = vmatprep.subr.msk.bf16.mxu1 %vm421_vm1, %v2099_v4  ;;  %v423_v9 = vsel %vm421_vm1, %v2096_v5, 0  ;;  %v429_v10 = vsel %vm421_vm1, %v2098_v6, 0  ;;  %v804_v14 = vld [vmem:[%s4320_s5] sm:$0xff]  ;;  %v1691_v33 = vunpack.c.h.bf16 %v2731_v2  ;;  %vm593_vm8 = vcmask 343040   ;;  %s2644_s24 = smov 108   ;;  %s2645_s25 = smov 88  }
  0x1a   : > { %449 = vmatpush1.bf16.msra.mxu0 %v423_v9  ;;  %500 = vmatpush1.bf16.msra.mxu1 %v429_v10  ;;  %v373_v18 = vld [vmem:[%s4316_s1] sm:$0xf]  ;;  %v555_v19 = vsub.s32 0, %v554_v17  ;;  %v559_v21 = vsub.s32 1, %v554_v17  ;;  %v563_v25 = vsub.s32 2, %v554_v17  ;;  %v567_v28 = vsub.s32 3, %v554_v17 }
  0x1b   : > { %388 = vperm.xlu0 %2154, %v379_v8   ;;  %2155 = vset.pattern.permute.xlu1 %v4326_v7  ;;  %vm374_vm3 = vcmp.gt.f32.partialorder %v373_v18, 0.0  ;;  %vm602_vm9 = vcmask 1047888   ;;  %s2646_s26 = smov 106   ;;  %s2647_s27 = smov 87   ;;  %vm628_vm10 = vcmask 1039360   ;;  %vm668_vm11 = vcmask 883712  }
  0x1c   : > { %393 = vperm.xlu1 %2155, %v380_v12   ;;  %v552_v20 = vsel %vm374_vm3, 1, %v4326_v7  ;;  %s2648_s28 = smov 86   ;;  %s2649_s29 = smov 109   ;;  %vm648_vm12 = vcmask 1031168   ;;  %vm688_vm13 = vcmask 875520   ;;  %vm708_vm14 = vcmask 867328  }
  0x1d   : > { %2101 = vmatmul.mubr.msk.bf16.vlgmr.msra.gmra.mxu0 %vm4373_vm2, %v2625_v11  ;;  %2104 = vmatmul.mubr.msk.bf16.vlgmr.msra.gmra.mxu1 %vm4373_vm2, %v2625_v11  ;;  %v2775_v22 = vrot.slane %v552_v20, %v555_v19  ;;  %v2777_v24 = vrot.slane %v552_v20, %v559_v21  ;;  %v2787_v29 = vrot.slane %v552_v20, %v563_v25  ;;  %s2650_s30 = smov 125   ;;  %s2651_s11 = smov 84   ;;  %vm748_vm15 = vcmask 711680  }
  0x1e   : > { %476 = vmatprep.mubr.bf16.mxu0 %v4326_v7  ;;  %527 = vmatprep.mubr.bf16.mxu1 %v4326_v7  ;;  %v2796_v32 = vrot.slane %v552_v20, %v567_v28  ;;  %s2652_s12 = smov 68   ;;  %s2653_s14 = smov 124   ;;  %vm728_vm0 = vcmask 719872   ;;  %vm768_vm3 = vcmask 703488  }
  0x1f   : > { %383 = vperm.xlu0 %2154, %v378_v13   ;;  %4422 = vst [vmem:[#allocation3_spill] sm:$0xff] %v2775_v22  ;;  %4423 = vst [vmem:[#allocation4_spill] sm:$0xff] %v2777_v24  ;;  %vm569_vm4 = vcmp.eq.s32.totalorder %v2775_v22, 1  ;;  %vm570_vm5 = vcmp.eq.s32.totalorder %v2777_v24, 1  ;;  %vm4374_vm6 = vcmp.eq.s32.totalorder %v2787_v29, 1  ;;  %s2654_s15 = smov 104  }
  0x20   : > { %807 = vperm.xlu1 %2155, %v804_v14   ;;  %v2782_v27 = vsel %vm569_vm4, %v1688_v23, -3.4e+38  ;;  %4424 = vst [vmem:[#allocation5_spill] sm:$0xff] %v2787_v29  ;;  %v2791_v30 = vsel %vm570_vm5, %v1689_v26, -3.4e+38  ;;  %4425 = vst [vmem:[#allocation6_spill] sm:$0xff] %v2796_v32 }
  0x21   : > { %v2802_v34 = vsel %vm4374_vm6, %v1690_v31, -3.4e+38  ;;  %vm572_vm7 = vcmp.eq.s32.totalorder %v2796_v32, 1  ;;  %s2655_s16 = smov 105   ;;  %s2656_s17 = smov 85  }
  0x22   : > { %v2809_v35 = vsel %vm572_vm7, %v1691_v33, -3.4e+38  ;;  %s2657_s18 = smov 67  }
  0x23   : > { %1700 = vrot.lane.b32.xlu0 %v2782_v27, %s2640_s19 }
  0x24   : > { %1702 = vrot.lane.b32.xlu1 %v2791_v30, %s2640_s19 }
  0x25   : > { %2102 = vmatmul.mubr.msk.bf16.gmra.mxu0 %vm4373_vm2, %v2626_v15  ;;  %2105 = vmatmul.mubr.msk.bf16.gmra.mxu1 %vm4373_vm2, %v2626_v15  ;;  %vm1312_vm2 = vcmask 687104  }
  0x26   : > { %970 = vmatprep.mubr.bf16.mxu0 %v4326_v7  ;;  %1011 = vmatprep.mubr.bf16.mxu1 %v4326_v7 }
  0x27   : > { %1704 = vrot.lane.b32.xlu0 %v2802_v34, %s2640_s19 }
  0x28   : > { %1706 = vrot.lane.b32.xlu1 %v2809_v35, %s2640_s19 }
  0x96   : > { %v389_v36 = vpop.permute.xlu0 %388 }
  0x97   : > { %v394_v37 = vpop.permute.xlu1 %393 }
  0x9a   : > { %v384_v38 = vpop.permute.xlu0 %383 }
  0x9b   : > { %v2813_v39 = vpop.permute.xlu1 %807 }
  0x9c   : > { %4426 = vst [vmem:[#allocation7_spill] sm:$0xff] %v2813_v39 }
  0x9e   : > { %v2815_v40 = vpop.permute.xlu0 %1700 }
  0x9f   : > { %v1703_v41 = vpop.permute.xlu1 %1702 }
  0xa0   : > { %v2819_v42 = vsel %vm593_vm8, %v2815_v40, %v1703_v41 }
  0xa1   : > { %1717 = vst [vmem:[#allocation2 + $0x8] sm:$0xff] %v2819_v42 }
  0xa2   : > { %v1705_v43 = vpop.permute.xlu0 %1704 }
  0xa3   : > { %v2823_v44 = vsel %vm593_vm8, %v1703_v41, %v1705_v43  ;;  %v2825_v45 = vpop.permute.xlu1 %1706 }
  0xa4   : > { %v2829_v46 = vsel %vm593_vm8, %v1705_v43, %v2825_v45 }
  0xdd   : > { %v468_v47 = vpop.f32.mrf.mxu0  ;;  %v519_v48 = vpop.f32.mrf.mxu1 }
  0xde   : > { %v469_v49 = vadd.f32 %v468_v47, %v384_v38  ;;  %v520_v50 = vadd.f32 %v519_v48, %v384_v38 }
  0xdf   : > { %v521_v51 = vpop.f32.mrf.mxu1  ;;  %v470_v52 = vpop.f32.mrf.mxu0 }
  0xe0   : > { %v536_v53 = vmax.f32 %v469_v49, 0.0  ;;  %v538_v54 = vmax.f32 %v520_v50, 0.0  ;;  %v522_v55 = vadd.f32 %v521_v51, %v384_v38  ;;  %v471_v56 = vadd.f32 %v470_v52, %v384_v38 }
  0xe1   : > { %v523_v57 = vpop.f32.mrf.mxu1  ;;  %v472_v58 = vpop.f32.mrf.mxu0 }
  0xe2   : > { %548 = vst [vmem:[%s2729_s23] sm:$0xff] %v536_v53  ;;  %550 = vst [vmem:[%s2729_s23 + $0x10] sm:$0xff] %v538_v54  ;;  %v539_v59 = vmax.f32 %v522_v55, 0.0  ;;  %v537_v60 = vmax.f32 %v471_v56, 0.0  ;;  %v524_v61 = vadd.f32 %v523_v57, %v389_v36  ;;  %v473_v62 = vadd.f32 %v472_v58, %v389_v36 }
  0xe3   : > { %v525_v63 = vpop.f32.mrf.mxu1  ;;  %v474_v0 = vpop.f32.mrf.mxu0 }
  0xe4   : > { %551 = vst [vmem:[%s2729_s23 + $0x18] sm:$0xff] %v539_v59  ;;  %549 = vst [vmem:[%s2729_s23 + $0x8] sm:$0xff] %v537_v60  ;;  %v540_v1 = vmax.f32 %v473_v62, 0.0  ;;  %v526_v2 = vadd.f32 %v525_v63, %v389_v36  ;;  %v475_v3 = vadd.f32 %v474_v0, %v389_v36  ;;  %v542_v6 = vmax.f32 %v524_v61, 0.0 }
  0xe5   : > { %v478_v4 = vpop.f32.mrf.mxu0  ;;  %v529_v5 = vpop.f32.mrf.mxu1 }
  0xe6   : > { %v541_v8 = vmax.f32 %v475_v3, 0.0  ;;  %v573_v9 = vsel %vm569_vm4, %v540_v1, 0.0  ;;  %v479_v10 = vadd.f32 %v478_v4, %v394_v37  ;;  %v543_v11 = vmax.f32 %v526_v2, 0.0 }
  0xe7   : > { %585 = vrot.lane.b32.xlu1 %v573_v9, %s2640_s19  ;;  %v480_v12 = vpop.f32.mrf.mxu0  ;;  %v531_v13 = vpop.f32.mrf.mxu1  ;;  %v530_v17 = vadd.f32 %v529_v5, %v394_v37  ;;  %v575_v21 = vsel %vm4374_vm6, %v542_v6, 0.0 }
  0xe8   : > { %v544_v14 = vmax.f32 %v479_v10, 0.0  ;;  %v574_v15 = vsel %vm570_vm5, %v541_v8, 0.0  ;;  %v481_v16 = vadd.f32 %v480_v12, %v394_v37  ;;  %v532_v23 = vadd.f32 %v531_v13, %v394_v37 }
  0xe9   : > { %587 = vrot.lane.b32.xlu0 %v574_v15, %s2640_s19  ;;  %v482_v18 = vpop.f32.mrf.mxu0  ;;  %v533_v19 = vpop.f32.mrf.mxu1  ;;  %v546_v28 = vmax.f32 %v530_v17, 0.0  ;;  %v576_v31 = vsel %vm572_vm7, %v543_v11, 0.0 }
  0xea   : > { %v545_v20 = vmax.f32 %v481_v16, 0.0  ;;  %v577_v33 = vsel %vm569_vm4, %v544_v14, 0.0  ;;  %v547_v36 = vmax.f32 %v532_v23, 0.0 }
  0xeb   : > { %589 = vrot.lane.b32.xlu1 %v575_v21, %s2640_s19  ;;  %v483_v25 = vpop.f32.mrf.mxu0  ;;  %v534_v26 = vpop.f32.mrf.mxu1  ;;  %v579_v37 = vsel %vm4374_vm6, %v546_v28, 0.0  ;;  %vm1331_vm6 = vcmask 556032  }
  0xec   : > { %v578_v38 = vsel %vm570_vm5, %v545_v20, 0.0  ;;  %v580_v41 = vsel %vm572_vm7, %v547_v36, 0.0  ;;  %v3057_v36 = vpack.i.bf16 %v2823_v44, %v2819_v42 }
  0xed   : > { %591 = vrot.lane.b32.xlu0 %v576_v31, %s2640_s19 }
  0xef   : > { %1032 = vrot.lane.b32.xlu1 %v577_v33, %s2640_s19 }
  0xf1   : > { %1034 = vrot.lane.b32.xlu0 %v578_v38, %s2640_s19 }
  0xf3   : > { %1036 = vrot.lane.b32.xlu1 %v579_v37, %s2640_s19 }
  0xf5   : > { %1038 = vrot.lane.b32.xlu0 %v580_v41, %s2640_s19  ;;  %s2658_s19 = smov 66  }
 0x159   : > { %v586_v43 = vpop.permute.xlu1 %585 }
 0x15a   : > { %603 = vst.msk [vmem:[#allocation2] sm:$0xff] %vm602_vm9, %v586_v43 }
 0x15b   : > { %v588_v47 = vpop.permute.xlu0 %587 }
 0x15d   : > { %v590_v48 = vpop.permute.xlu1 %589 }
 0x15f   : > { %v592_v49 = vpop.permute.xlu0 %591 }
 0x160   : > { %607 = vst.msk [vmem:[#allocation2 + $0x20] sm:$0xff] %vm593_vm8, %v592_v49  ;;  %v2885_v56 = vsel %vm593_vm8, %v590_v48, %v592_v49 }
 0x161   : > { %v2861_v50 = vld [vmem:[#allocation2] sm:$0xff]  ;;  %v2863_v51 = vpop.permute.xlu1 %1032 }
 0x162   : > { %1048 = vst.msk [vmem:[#allocation2] sm:$0xff] %vm602_vm9, %v2863_v51 }
 0x163   : > { %v2867_v52 = vpop.permute.xlu0 %1034 }
 0x164   : > { %v2959_v0 = vsel %vm593_vm8, %v2863_v51, %v2867_v52 }
 0x165   : > { %v1037_v60 = vpop.permute.xlu1 %1036  ;;  %4431 = vst [vmem:[#allocation12_spill] sm:$0xff] %v2959_v0 }
 0x166   : > { %v2939_v61 = vsel %vm593_vm8, %v2867_v52, %v1037_v60 }
 0x167   : > { %v2869_v53 = vld [vmem:[#allocation2 + $0x20] sm:$0xff]  ;;  %v1039_v54 = vpop.permute.xlu0 %1038  ;;  %4429 = vst [vmem:[#allocation10_spill] sm:$0xff] %v2939_v61  ;;  %v2256_v2 = vpack.i.bf16 %v2939_v61, %v2959_v0 }
 0x168   : > { %1052 = vst.msk [vmem:[#allocation2 + $0x20] sm:$0xff] %vm593_vm8, %v1039_v54  ;;  %646 = vrot.lane.b32.xlu0 %v2869_v53, %s2641_s20  ;;  %626 = vrot.lane.b32.xlu1 %v2869_v53, %s2642_s21  ;;  %v2942_v62 = vsel %vm593_vm8, %v1037_v60, %v1039_v54  ;;  %v2241_v3 = vpack.i.bf16 %v2959_v0, %v2869_v53 }
 0x169   : > { %v2876_v55 = vld [vmem:[#allocation2] sm:$0xff]  ;;  %4430 = vst [vmem:[#allocation11_spill] sm:$0xff] %v2942_v62  ;;  %v2950_v63 = vpack.i.bf16 %v2942_v62, %v2939_v61 }
 0x16a   : > { %4427 = vst [vmem:[#allocation8_spill] sm:$0xff] %v2876_v55  ;;  %1716 = vst.msk [vmem:[#allocation2] sm:$0xff] %vm602_vm9, %v2815_v40  ;;  %v2896_v40 = vsel %vm593_vm8, %v588_v47, %v590_v48  ;;  %v2246_v4 = vpack.i.bf16 %v2959_v0, %v2876_v55  ;;  %vm1201_vm9 = vcmask 859136  }
 0x16b   : > { %v2161_v58 = vpack.i.bf16 %v2885_v56, %v2896_v40 }
 0x16c   : > { %686 = vrot.lane.b32.xlu0 %v2869_v53, %s2643_s22  ;;  %666 = vrot.lane.b32.xlu1 %v2869_v53, %s2644_s24 }
 0x16f   : > { %v2887_v57 = vld [vmem:[#allocation2 + $0x20] sm:$0xff] }
 0x170   : > { %4428 = vst [vmem:[#allocation9_spill] sm:$0xff] %v2887_v57  ;;  %1720 = vst.msk [vmem:[#allocation2 + $0x20] sm:$0xff] %vm593_vm8, %v2825_v45  ;;  %726 = vrot.lane.b32.xlu0 %v2869_v53, %s2645_s25  ;;  %706 = vrot.lane.b32.xlu1 %v2869_v53, %s2646_s26  ;;  %v2904_v45 = vsel %vm593_vm8, %v586_v43, %v588_v47  ;;  %v2236_v1 = vpack.i.bf16 %v2876_v55, %v2887_v57  ;;  %vm1109_vm8 = vcmask 1022976  }
 0x171   : > { %v2156_v59 = vpack.i.bf16 %v2904_v45, %v2861_v50  ;;  %v2261_v5 = vpack.i.bf16 %v2887_v57, %v2942_v62  ;;  %v3012_v13 = vld [vmem:[#allocation2] sm:$0xff] }
 0x172   : > { %v2406_v16 = vpack.i.bf16 %v3012_v13, %v2876_v55  ;;  %v2401_v21 = vpack.i.bf16 %v3012_v13, %v2887_v57 }
 0x174   : > { %746 = vrot.lane.b32.xlu1 %v2869_v53, %s2647_s27  ;;  %2162 = vrot.lane.b32.xlu0 %v2161_v58, %s2642_s21 }
 0x177   : > { %v3036_v23 = vld [vmem:[#allocation2 + $0x20] sm:$0xff] }
 0x178   : > { %2157 = vrot.lane.b32.xlu1 %v2156_v59, %s2642_s21  ;;  %2167 = vrot.lane.b32.xlu0 %v2156_v59, %s2641_s20  ;;  %4432 = vst [vmem:[#allocation13_spill] sm:$0xff] %v3036_v23  ;;  %v3046_v28 = vpack.i.bf16 %v3036_v23, %v2829_v46 }
 0x17c   : > { %2172 = vrot.lane.b32.xlu1 %v2161_v58, %s2641_s20  ;;  %2182 = vrot.lane.b32.xlu0 %v2161_v58, %s2644_s24 }
 0x180   : > { %2177 = vrot.lane.b32.xlu1 %v2156_v59, %s2644_s24  ;;  %2187 = vrot.lane.b32.xlu0 %v2156_v59, %s2643_s22 }
 0x184   : > { %2192 = vrot.lane.b32.xlu1 %v2161_v58, %s2643_s22  ;;  %2202 = vrot.lane.b32.xlu0 %v2161_v58, %s2646_s26 }
 0x188   : > { %2197 = vrot.lane.b32.xlu1 %v2156_v59, %s2646_s26  ;;  %2207 = vrot.lane.b32.xlu0 %v2156_v59, %s2645_s25 }
 0x18c   : > { %2212 = vrot.lane.b32.xlu1 %v2161_v58, %s2645_s25  ;;  %2222 = vrot.lane.b32.xlu0 %v2161_v58, %s2647_s27 }
 0x190   : > { %2217 = vrot.lane.b32.xlu1 %v2156_v59, %s2647_s27  ;;  %2227 = vrot.lane.b32.xlu0 %v2156_v59, %s2648_s28 }
 0x194   : > { %2232 = vrot.lane.b32.xlu1 %v2161_v58, %s2648_s28  ;;  %1137 = vrot.lane.b32.xlu0 %v2876_v55, %s2644_s24 }
 0x198   : > { %1340 = vrot.lane.b32.xlu1 %v2876_v55, %s2649_s29  ;;  %1081 = vrot.lane.b32.xlu0 %v2876_v55, %s2641_s20 }
 0x19c   : > { %1099 = vrot.lane.b32.xlu1 %v2876_v55, %s2650_s30  ;;  %1063 = vrot.lane.b32.xlu0 %v2876_v55, %s2642_s21 }
 0x1a0   : > { %1302 = vrot.lane.b32.xlu1 %v2876_v55, %s2651_s11  ;;  %1321 = vrot.lane.b32.xlu0 %v2876_v55, %s2652_s12 }
 0x1a4   : > { %1118 = vrot.lane.b32.xlu1 %v2876_v55, %s2653_s14  ;;  %1229 = vrot.lane.b32.xlu0 %v2876_v55, %s2645_s25 }
 0x1a8   : > { %1210 = vrot.lane.b32.xlu0 %v2876_v55, %s2654_s15  ;;  %2252 = vrot.lane.b32.xlu1 %v2950_v63, %s2655_s16 }
 0x1ac   : > { %2237 = vrot.lane.b32.xlu0 %v2236_v1, %s2648_s28  ;;  %2257 = vrot.lane.b32.xlu1 %v2256_v2, %s2643_s22 }
 0x1b0   : > { %2242 = vrot.lane.b32.xlu0 %v2241_v3, %s2648_s28  ;;  %2267 = vrot.lane.b32.xlu1 %v2256_v2, %s2646_s26 }
 0x1b4   : > { %2247 = vrot.lane.b32.xlu0 %v2246_v4, %s2655_s16  ;;  %2277 = vrot.lane.b32.xlu1 %v2256_v2, %s2644_s24 }
 0x1b8   : > { %2262 = vrot.lane.b32.xlu0 %v2261_v5, %s2643_s22  ;;  %2287 = vrot.lane.b32.xlu1 %v2256_v2, %s2649_s29 }
 0x1bc   : > { %2272 = vrot.lane.b32.xlu0 %v2261_v5, %s2646_s26  ;;  %2302 = vrot.lane.b32.xlu1 %v2261_v5, %s2641_s20 }
 0x1c0   : > { %2282 = vrot.lane.b32.xlu0 %v2261_v5, %s2644_s24  ;;  %2312 = vrot.lane.b32.xlu1 %v2261_v5, %s2650_s30 }
 0x1c4   : > { %2292 = vrot.lane.b32.xlu0 %v2261_v5, %s2649_s29  ;;  %2322 = vrot.lane.b32.xlu1 %v2261_v5, %s2642_s21 }
 0x1c8   : > { %2297 = vrot.lane.b32.xlu0 %v2256_v2, %s2641_s20  ;;  %2327 = vrot.lane.b32.xlu1 %v2256_v2, %s2651_s11  ;;  %s2659_s20 = smov 65  }
 0x1cc   : > { %2307 = vrot.lane.b32.xlu0 %v2256_v2, %s2650_s30  ;;  %2337 = vrot.lane.b32.xlu1 %v2256_v2, %s2652_s12 }
 0x1d0   : > { %2317 = vrot.lane.b32.xlu0 %v2256_v2, %s2642_s21  ;;  %2347 = vrot.lane.b32.xlu1 %v2950_v63, %s2648_s28 }
 0x1d4   : > { %2332 = vrot.lane.b32.xlu0 %v2261_v5, %s2651_s11  ;;  %2352 = vrot.lane.b32.xlu1 %v2256_v2, %s2656_s17 }
 0x1d8   : > { %2342 = vrot.lane.b32.xlu0 %v2261_v5, %s2652_s12  ;;  %2367 = vrot.lane.b32.xlu1 %v2261_v5, %s2645_s25 }
 0x1da   : > { %v2996_v6 = vpop.permute.xlu0 %646  ;;  %v2998_v8 = vpop.permute.xlu1 %626 }
 0x1db   : > { %v782_v42 = vpack.c.bf16 %v2998_v8, %v2869_v53 }
 0x1dc   : > { %2357 = vrot.lane.b32.xlu0 %v2261_v5, %s2656_s17  ;;  %2377 = vrot.lane.b32.xlu1 %v2261_v5, %s2647_s27 }
 0x1de   : > { %v3002_v9 = vpop.permute.xlu0 %686  ;;  %v3004_v10 = vpop.permute.xlu1 %666 }
 0x1df   : > { %v787_v38 = vpack.c.bf16 %v3004_v10, %v2996_v6 }
 0x1e0   : > { %2362 = vrot.lane.b32.xlu0 %v2256_v2, %s2645_s25  ;;  %2387 = vrot.lane.b32.xlu1 %v2261_v5, %s2654_s15 }
 0x1e2   : > { %v3008_v11 = vpop.permute.xlu0 %726  ;;  %v3010_v12 = vpop.permute.xlu1 %706 }
 0x1e3   : > { %v792_v52 = vpack.c.bf16 %v3010_v12, %v3002_v9 }
 0x1e4   : > { %2372 = vrot.lane.b32.xlu0 %v2256_v2, %s2647_s27  ;;  %2392 = vrot.lane.b32.xlu1 %v2256_v2, %s2653_s14 }
 0x1e6   : > { %v3016_v14 = vpop.permute.xlu0 %2162  ;;  %v3018_v15 = vpop.permute.xlu1 %746 }
 0x1e7   : > { %v797_v43 = vpack.c.bf16 %v3018_v15, %v3008_v11  ;;  %v4328_v58 = vunpack.i.h.bf16 %v3016_v14  ;;  %v4336_v59 = vunpack.i.l.bf16 %v3016_v14 }
 0x1e8   : > { %2382 = vrot.lane.b32.xlu0 %v2256_v2, %s2654_s15  ;;  %2407 = vrot.lane.b32.xlu1 %v2406_v16, %s2643_s22 }
 0x1e9   : > { %v631_v4 = vsel %vm628_vm10, %v4336_v59, %v4328_v58 }
 0x1ea   : > { %v3024_v17 = vpop.permute.xlu0 %2167  ;;  %v3026_v18 = vpop.permute.xlu1 %2157 }
 0x1eb   : > { %v4335_v49 = vunpack.i.h.bf16 %v3026_v18  ;;  %v2159_v51 = vunpack.i.l.bf16 %v3026_v18  ;;  %v4445_v61 = vunpack.i.h.bf16 %v3026_v18 }
 0x1ec   : > { %2397 = vrot.lane.b32.xlu0 %v2261_v5, %s2653_s14  ;;  %2417 = vrot.lane.b32.xlu1 %v2406_v16, %s2656_s17 }
 0x1ed   : > { %v629_v60 = vsel %vm628_vm10, %v2159_v51, %v4335_v49 }
 0x1ee   : > { %v3030_v19 = vpop.permute.xlu0 %2182  ;;  %v3032_v20 = vpop.permute.xlu1 %2172  ;;  %v778_v3 = vpack.c.bf16 %v629_v60, %v2861_v50  ;;  %v780_v50 = vpack.c.bf16 %v631_v4, %v2896_v40 }
 0x1ef   : > { %v4332_v51 = vunpack.i.h.bf16 %v3030_v19 }
 0x1f0   : > { %2402 = vrot.lane.b32.xlu0 %v2401_v21, %s2655_s16  ;;  %2422 = vrot.lane.b32.xlu1 %v2406_v16, %s2647_s27  ;;  %v4331_v21 = vunpack.i.l.bf16 %v3032_v20 }
 0x1f1   : > { %v672_v58 = vsel %vm668_vm11, %v4332_v51, %v3004_v10 }
 0x1f2   : > { %v3040_v25 = vpop.permute.xlu0 %2187  ;;  %v3042_v26 = vpop.permute.xlu1 %2177 }
 0x1f3   : > { %v4330_v5 = vunpack.i.h.bf16 %v3042_v26 }
 0x1f4   : > { %2412 = vrot.lane.b32.xlu0 %v2406_v16, %s2646_s26  ;;  %2432 = vrot.lane.b32.xlu1 %v3046_v28, %s2643_s22  ;;  %v4329_v16 = vunpack.i.l.bf16 %v3030_v19 }
 0x1f6   : > { %v3051_v31 = vpop.permute.xlu0 %2202  ;;  %v3053_v33 = vpop.permute.xlu1 %2192  ;;  %v670_v60 = vsel %vm668_vm11, %v4330_v5, %v4329_v16 }
 0x1f8   : > { %2437 = vrot.lane.b32.xlu1 %v3057_v36, %s2646_s26  ;;  %2427 = vrot.lane.b32.xlu0 %v3057_v36, %s2643_s22 }
 0x1fa   : > { %v3065_v37 = vpop.permute.xlu0 %2207  ;;  %v3067_v41 = vpop.permute.xlu1 %2197 }
 0x1fb   : > { %v4338_v16 = vunpack.i.h.bf16 %v3067_v41  ;;  %v2199_v5 = vunpack.i.l.bf16 %v3067_v41 }
 0x1fc   : > { %2442 = vrot.lane.b32.xlu0 %v3046_v28, %s2646_s26  ;;  %853 = vrot.lane.b32.xlu1 %v787_v38, %s2643_s22 }
 0x1fe   : > { %v3076_v47 = vpop.permute.xlu0 %2222  ;;  %v3078_v48 = vpop.permute.xlu1 %2212 }
 0x200   : > { %843 = vrot.lane.b32.xlu0 %v782_v42, %s2643_s22  ;;  %873 = vrot.lane.b32.xlu1 %v797_v43, %s2643_s22  ;;  %v4333_v43 = vunpack.i.h.bf16 %v3024_v17 }
 0x202   : > { %v3086_v53 = vpop.permute.xlu0 %2227  ;;  %v3088_v54 = vpop.permute.xlu1 %2217  ;;  %v650_v40 = vsel %vm648_vm12, %v4333_v43, %v4331_v21  ;;  %v4339_v21 = vunpack.i.h.bf16 %v3040_v25 }
 0x203   : > { %v784_v7 = vpack.c.bf16 %v670_v60, %v650_v40  ;;  %v2189_v60 = vunpack.i.l.bf16 %v3040_v25 }
 0x204   : > { %863 = vrot.lane.b32.xlu0 %v792_v52, %s2643_s22  ;;  %v4334_v52 = vunpack.i.h.bf16 %v3032_v20 }
 0x205   : > { %v689_v59 = vsel %vm688_vm13, %v2189_v60, %v4339_v21  ;;  %v4344_v60 = vunpack.i.l.bf16 %v3076_v47 }
 0x206   : > { %v3096_v1 = vpop.permute.xlu0 %1137  ;;  %v3098_v2 = vpop.permute.xlu1 %2232 }
 0x207   : > { %v4446_v57 = vunpack.i.h.bf16 %v3098_v2 }
 0x208   : > { %835 = vrot.lane.b32.xlu0 %v778_v3, %s2643_s22 }
 0x20a   : > { %v3110_v38 = vpop.permute.xlu0 %1081  ;;  %v3112_v42 = vpop.permute.xlu1 %1340 }
 0x20b   : > { %4433 = vst [vmem:[#allocation14_spill] sm:$0xff] %v3112_v42  ;;  %v2169_v42 = vunpack.i.l.bf16 %v3024_v17 }
 0x20c   : > { %839 = vrot.lane.b32.xlu0 %v780_v50, %s2643_s22  ;;  %v652_v50 = vsel %vm648_vm12, %v4334_v52, %v2996_v6  ;;  %v4340_v6 = vunpack.i.l.bf16 %v3051_v31  ;;  %v4342_v52 = vunpack.i.h.bf16 %v3053_v33 }
 0x20d   : > { %v786_v43 = vpack.c.bf16 %v672_v58, %v652_v50  ;;  %v4435_v50 = vunpack.i.h.bf16 %v3051_v31 }
 0x20e   : > { %v3129_v3 = vpop.permute.xlu0 %1063  ;;  %v3131_v4 = vpop.permute.xlu1 %1099 }
 0x20f   : > { %4434 = vst [vmem:[#allocation15_spill] sm:$0xff] %v3129_v3  ;;  %v711_v49 = vsel %vm708_vm14, %v4340_v6, %v4435_v50  ;;  %v4348_v6 = vunpack.i.h.bf16 %v3065_v37 }
 0x210   : > { %847 = vrot.lane.b32.xlu0 %v784_v7, %s2643_s22  ;;  %v709_v7 = vsel %vm708_vm14, %v2199_v5, %v4338_v16  ;;  %v4436_v5 = vunpack.i.l.bf16 %v3053_v33  ;;  %v4345_v16 = vunpack.i.h.bf16 %v3088_v54 }
 0x211   : > { %v788_v58 = vpack.c.bf16 %v709_v7, %v689_v59  ;;  %v4347_v59 = vunpack.i.l.bf16 %v3078_v48 }
 0x212   : > { %v3147_v10 = vpop.permute.xlu0 %1321  ;;  %v3149_v51 = vpop.permute.xlu1 %1302 }
 0x214   : > { %851 = vrot.lane.b32.xlu0 %v786_v43, %s2643_s22  ;;  %v691_v43 = vsel %vm688_vm13, %v4436_v5, %v4342_v52  ;;  %v2229_v52 = vunpack.i.l.bf16 %v3086_v53 }
 0x215   : > { %v790_v50 = vpack.c.bf16 %v711_v49, %v691_v43  ;;  %v730_v49 = vsel %vm728_vm0, %v4348_v6, %v4347_v59 }
 0x216   : > { %v3161_v40 = vpop.permute.xlu0 %1229  ;;  %v3163_v39 = vpop.permute.xlu1 %1118 }
 0x218   : > { %855 = vrot.lane.b32.xlu0 %v788_v58, %s2643_s22  ;;  %v750_v58 = vsel %vm748_vm15, %v4345_v16, %v4344_v60  ;;  %v4437_v60 = vunpack.i.h.bf16 %v3076_v47  ;;  %v4438_v16 = vunpack.i.h.bf16 %v3078_v48 }
 0x219   : > { %v794_v32 = vpack.c.bf16 %v750_v58, %v730_v49 }
 0x21a   : > { %v3179_v7 = vpop.permute.xlu0 %1210  ;;  %v3181_v21 = vpop.permute.xlu1 %2252  ;;  %v732_v24 = vsel %vm728_vm0, %v4438_v16, %v3008_v11 }
 0x21c   : > { %859 = vrot.lane.b32.xlu0 %v790_v50, %s2643_s22  ;;  %v752_v50 = vsel %vm748_vm15, %v4437_v60, %v3018_v15  ;;  %v4440_v15 = vunpack.i.h.bf16 %v3086_v53 }
 0x21d   : > { %v796_v22 = vpack.c.bf16 %v752_v50, %v732_v24 }
 0x21e   : > { %v3199_v5 = vpop.permute.xlu0 %2237  ;;  %v3201_v29 = vpop.permute.xlu1 %2257  ;;  %v769_v60 = vsel %vm768_vm3, %v2229_v52, %v4440_v15 }
 0x21f   : > { %v2260_v59 = vunpack.i.h.bf16 %v3201_v29  ;;  %v4442_v52 = vunpack.i.l.bf16 %v3201_v29  ;;  %v798_v62 = vpack.c.bf16 %v769_v60, %v769_v60  ;;  %v2179_v60 = vunpack.i.l.bf16 %v3042_v26 }
 0x220   : > { %867 = vrot.lane.b32.xlu0 %v794_v32, %s2643_s22 }
 0x221   : > { %v3239_v50 = vsel %vm688_vm13, %v4442_v52, %v2260_v59  ;;  %v4447_v52 = vunpack.i.l.bf16 %v3098_v2 }
 0x222   : > { %v3215_v58 = vpop.permute.xlu0 %2242  ;;  %v3217_v49 = vpop.permute.xlu1 %2267  ;;  %4443 = vst [vmem:[#allocation18_spill] sm:$0xff] %v3239_v50 }
 0x223   : > { %4439 = vst [vmem:[#allocation16_spill] sm:$0xff] %v3215_v58  ;;  %v3224_v16 = vunpack.i.l.bf16 %v3215_v58  ;;  %v2270_v32 = vunpack.i.h.bf16 %v3217_v49  ;;  %v4356_v6 = vunpack.i.l.bf16 %v3217_v49  ;;  %v771_v3 = vsel %vm768_vm3, %v4447_v52, %v4446_v57 }
 0x224   : > { %871 = vrot.lane.b32.xlu0 %v796_v22, %s2643_s22  ;;  %v4444_v22 = vunpack.i.l.bf16 %v3016_v14 }
 0x225   : > { %v802_v43 = vpack.c.bf16 %v3224_v16, %v3224_v16  ;;  %v3234_v24 = vsel %vm708_vm14, %v4356_v6, %v2270_v32  ;;  %v800_v6 = vpack.c.bf16 %v771_v3, %v771_v3  ;;  %v4450_v3 = vunpack.i.h.bf16 %v3024_v17 }
 0x226   : > { %4441 = vst [vmem:[#allocation17_spill] sm:$0xff] %v3234_v24  ;;  %v3241_v15 = vpop.permute.xlu0 %2247  ;;  %v3243_v11 = vpop.permute.xlu1 %2277  ;;  %v630_v23 = vsel %vm628_vm10, %v4445_v61, %v4444_v22  ;;  %v4448_v61 = vunpack.i.h.bf16 %v3016_v14 }
 0x227   : > { %883 = vrot.lane.b32.xlu1 %v802_v43, %s2643_s22  ;;  %v779_v0 = vpack.c.bf16 %v630_v23, %v2904_v45  ;;  %v4449_v45 = vunpack.i.h.bf16 %v3042_v26 }
 0x228   : > { %875 = vrot.lane.b32.xlu0 %v798_v62, %s2643_s22  ;;  %v632_v18 = vsel %vm628_vm10, %v4448_v61, %v2998_v8 }
 0x229   : > { %v669_v14 = vsel %vm668_vm11, %v2179_v60, %v4449_v45  ;;  %v781_v8 = vpack.c.bf16 %v632_v18, %v2885_v56 }
 0x22a   : > { %v3265_v22 = vpop.permute.xlu0 %2262  ;;  %v3267_v43 = vpop.permute.xlu1 %2287 }
 0x22b   : > { %837 = vrot.lane.b32.xlu1 %v779_v0, %s2643_s22  ;;  %v2264_v62 = vunpack.i.l.bf16 %v3265_v22  ;;  %v649_v0 = vsel %vm648_vm12, %v2169_v42, %v4450_v3  ;;  %v4451_v26 = vunpack.i.h.bf16 %v3265_v22 }
 0x22c   : > { %879 = vrot.lane.b32.xlu0 %v800_v6, %s2643_s22  ;;  %v783_v17 = vpack.c.bf16 %v669_v14, %v649_v0  ;;  %v4458_v14 = vunpack.i.h.bf16 %v3032_v20 }
 0x22d   : > { %v3291_v6 = vsel %vm688_vm13, %v2264_v62, %v4451_v26  ;;  %v3294_v56 = vsel %vm688_vm13, %v2260_v59, %v2264_v62  ;;  %v4456_v59 = vunpack.i.h.bf16 %v3030_v19  ;;  %v4457_v62 = vunpack.i.l.bf16 %v3030_v19 }
 0x22e   : > { %v3278_v23 = vpop.permute.xlu0 %2272  ;;  %v3280_v52 = vpop.permute.xlu1 %2302  ;;  %4452 = vst [vmem:[#allocation19_spill] sm:$0xff] %v3291_v6  ;;  %4453 = vst [vmem:[#allocation20_spill] sm:$0xff] %v3294_v56 }
 0x22f   : > { %v4360_v61 = vunpack.i.h.bf16 %v3278_v23  ;;  %v2274_v57 = vunpack.i.l.bf16 %v3278_v23  ;;  %841 = vrot.lane.b32.xlu1 %v781_v8, %s2643_s22  ;;  %v4365_v18 = vunpack.i.h.bf16 %v3280_v52  ;;  %v4367_v45 = vunpack.i.l.bf16 %v3280_v52 }
 0x230   : > { %2452 = vrot.lane.b32.xlu0 %v3046_v28, %s2655_s16  ;;  %v671_v8 = vsel %vm668_vm11, %v4457_v62, %v4456_v59 }
 0x231   : > { %v3299_v42 = vsel %vm708_vm14, %v2270_v32, %v2274_v57  ;;  %v3304_v60 = vsel %vm708_vm14, %v2274_v57, %v4360_v61  ;;  %v4459_v32 = vunpack.i.l.bf16 %v3032_v20  ;;  %v3336_v20 = vsel %vm648_vm12, %v4367_v45, %v4365_v18 }
 0x232   : > { %4454 = vst [vmem:[#allocation21_spill] sm:$0xff] %v3299_v42  ;;  %4455 = vst [vmem:[#allocation22_spill] sm:$0xff] %v3304_v60  ;;  %v3320_v0 = vpop.permute.xlu0 %2282  ;;  %v3322_v26 = vpop.permute.xlu1 %2312  ;;  %v2219_v61 = vunpack.i.l.bf16 %v3088_v54 }
 0x233   : > { %v651_v3 = vsel %vm648_vm12, %v4459_v32, %v4458_v14  ;;  %4460 = vst [vmem:[#allocation23_spill] sm:$0xff] %v3322_v26  ;;  %v4366_v19 = vunpack.i.h.bf16 %v3322_v26  ;;  %v2314_v59 = vunpack.i.l.bf16 %v3322_v26  ;;  %845 = vrot.lane.b32.xlu1 %v783_v17, %s2643_s22  ;;  %4461 = vst [vmem:[#allocation24_spill] sm:$0xff] %v3336_v20  ;;  %v4463_v32 = vunpack.i.l.bf16 %v3051_v31 }
 0x234   : > { %2457 = vrot.lane.b32.xlu0 %v3057_v36, %s2647_s27  ;;  %v785_v14 = vpack.c.bf16 %v671_v8, %v651_v3  ;;  %v4464_v17 = vunpack.i.h.bf16 %v3067_v41  ;;  %v4466_v8 = vunpack.i.h.bf16 %v3040_v25  ;;  %v2209_v41 = vunpack.i.l.bf16 %v3065_v37 }
 0x235   : > { %v3341_v62 = vsel %vm1109_vm8, %v2314_v59, %v4366_v19  ;;  %v4465_v19 = vunpack.i.l.bf16 %v3053_v33  ;;  %v4469_v25 = vunpack.i.h.bf16 %v3088_v54  ;;  %v4471_v54 = vunpack.i.h.bf16 %v3076_v47 }
 0x236   : > { %4462 = vst [vmem:[#allocation25_spill] sm:$0xff] %v3341_v62  ;;  %v710_v57 = vsel %vm708_vm14, %v4464_v17, %v4463_v32  ;;  %v3349_v60 = vpop.permute.xlu0 %2292  ;;  %v3351_v42 = vpop.permute.xlu1 %2322  ;;  %v4467_v32 = vunpack.i.h.bf16 %v3051_v31  ;;  %v2249_v62 = vunpack.i.l.bf16 %v3241_v15 }
 0x237   : > { %849 = vrot.lane.b32.xlu1 %v785_v14, %s2643_s22  ;;  %v690_v3 = vsel %vm688_vm13, %v4466_v8, %v4465_v19  ;;  %v4468_v14 = vunpack.i.h.bf16 %v3053_v33  ;;  %v749_v19 = vsel %vm748_vm15, %v2219_v61, %v4469_v25  ;;  %v2250_v8 = vunpack.i.h.bf16 %v3241_v15 }
 0x238   : > { %2467 = vrot.lane.b32.xlu0 %v3057_v36, %s2656_s17  ;;  %v712_v17 = vsel %vm708_vm14, %v4467_v32, %v3010_v12  ;;  %v789_v45 = vpack.c.bf16 %v710_v57, %v690_v3  ;;  %v3382_v12 = vpack.i.bf16 %v2829_v46, %v2823_v44  ;;  %v4472_v15 = vunpack.i.l.bf16 %v3076_v47 }
 0x239   : > { %v692_v18 = vsel %vm688_vm13, %v4468_v14, %v3002_v9  ;;  %v4470_v9 = vunpack.i.h.bf16 %v3065_v37  ;;  %v4473_v44 = vunpack.i.h.bf16 %v3078_v48  ;;  %v4474_v46 = vunpack.i.l.bf16 %v3078_v48 }
 0x23a   : > { %v2298_v20 = vpop.permute.xlu0 %2297  ;;  %v3377_v26 = vpop.permute.xlu1 %2327  ;;  %v751_v61 = vsel %vm748_vm15, %v4472_v15, %v4471_v54  ;;  %v4377_v3 = vunpack.i.l.bf16 %v3181_v21  ;;  %v4375_v25 = vunpack.i.h.bf16 %v3351_v42 }
 0x23b   : > { %857 = vrot.lane.b32.xlu1 %v789_v45, %s2643_s22  ;;  %v729_v31 = vsel %vm728_vm0, %v2209_v41, %v4470_v9  ;;  %v2299_v33 = vunpack.i.l.bf16 %v2298_v20  ;;  %v731_v37 = vsel %vm728_vm0, %v4474_v46, %v4473_v44  ;;  %v791_v45 = vpack.c.bf16 %v712_v17, %v692_v18 }
 0x23c   : > { %2477 = vrot.lane.b32.xlu0 %v2950_v63, %s2657_s18  ;;  %v793_v57 = vpack.c.bf16 %v749_v19, %v729_v31  ;;  %v3401_v41 = vsel %vm1201_vm9, %v2249_v62, %v2250_v8  ;;  %v2300_v63 = vunpack.i.h.bf16 %v2298_v20  ;;  %v2329_v32 = vunpack.i.l.bf16 %v3377_v26 }
 0x23d   : > { %4475 = vst [vmem:[#allocation26_spill] sm:$0xff] %v3401_v41  ;;  %v2324_v18 = vunpack.i.l.bf16 %v3351_v42  ;;  %v3412_v62 = vsel %vm648_vm12, %v3110_v38, %v2299_v33  ;;  %v2330_v20 = vunpack.i.h.bf16 %v3377_v26  ;;  %v3435_v26 = vsel %vm1201_vm9, %v2250_v8, %v4377_v3 }
 0x23e   : > { %v2308_v14 = vpop.permute.xlu0 %2307  ;;  %v3404_v47 = vpop.permute.xlu1 %2337  ;;  %4476 = vst [vmem:[#allocation27_spill] sm:$0xff] %v3412_v62  ;;  %v4481_v44 = vunpack.i.l.bf16 %v3280_v52  ;;  %v3444_v46 = vsel %vm1312_vm2, %v3149_v51, %v2329_v32  ;;  %v4384_v3 = vunpack.i.h.bf16 %v3215_v58  ;;  %v2239_v58 = vunpack.i.l.bf16 %v3199_v5 }
 0x23f   : > { %v2310_v9 = vunpack.i.h.bf16 %v2308_v14  ;;  %v2309_v54 = vunpack.i.l.bf16 %v2308_v14  ;;  %v2339_v48 = vunpack.i.l.bf16 %v3404_v47  ;;  %861 = vrot.lane.b32.xlu1 %v791_v45, %s2643_s22  ;;  %v2340_v17 = vunpack.i.h.bf16 %v3404_v47  ;;  %4483 = vst [vmem:[#allocation33_spill] sm:$0xff] %v3444_v46 }
 0x240   : > { %2487 = vrot.lane.b32.xlu0 %v3046_v28, %s2657_s18  ;;  %v3451_v14 = vsel %vm648_vm12, %v2299_v33, %v2300_v63  ;;  %v3462_v51 = vsel %vm1312_vm2, %v2329_v32, %v2330_v20  ;;  %v4487_v47 = vunpack.i.l.bf16 %v3098_v2 }
 0x241   : > { %v3420_v19 = vsel %vm1109_vm8, %v3131_v4, %v2309_v54  ;;  %v3423_v31 = vsel %vm1109_vm8, %v2309_v54, %v2310_v9  ;;  %v3426_v15 = vsel %vm1109_vm8, %v2310_v9, %v2314_v59  ;;  %v3430_v38 = vsel %vm1331_vm6, %v3147_v10, %v2339_v48  ;;  %4484 = vst [vmem:[#allocation34_spill] sm:$0xff] %v3451_v14 }
 0x242   : > { %4477 = vst [vmem:[#allocation28_spill] sm:$0xff] %v3420_v19  ;;  %4478 = vst [vmem:[#allocation29_spill] sm:$0xff] %v3423_v31  ;;  %v3440_v4 = vsel %vm648_vm12, %v2300_v63, %v4481_v44  ;;  %v3448_v45 = vpop.permute.xlu0 %2317  ;;  %v2348_v10 = vpop.permute.xlu1 %2347  ;;  %v3465_v33 = vsel %vm1331_vm6, %v2339_v48, %v2340_v17  ;;  %v3472_v54 = vsel %vm628_vm10, %v2324_v18, %v4375_v25  ;;  %v4488_v25 = vunpack.i.h.bf16 %v3086_v53 }
 0x243   : > { %4479 = vst [vmem:[#allocation30_spill] sm:$0xff] %v3426_v15  ;;  %4480 = vst [vmem:[#allocation31_spill] sm:$0xff] %v3430_v38  ;;  %v4376_v9 = vunpack.i.h.bf16 %v3448_v45  ;;  %865 = vrot.lane.b32.xlu1 %v793_v57, %s2643_s22  ;;  %v795_v44 = vpack.c.bf16 %v751_v61, %v731_v37  ;;  %v2506_v63 = vpack.i.bf16 %v3435_v26, %v3401_v41  ;;  %vm1293_vm12 = vcmask 695296  }
 0x244   : > { %4482 = vst [vmem:[#allocation32_spill] sm:$0xff] %v3440_v4  ;;  %2497 = vrot.lane.b32.xlu0 %v3382_v12, %s2658_s19  ;;  %4485 = vst [vmem:[#allocation35_spill] sm:$0xff] %v3462_v51 }
 0x245   : > { %4486 = vst [vmem:[#allocation36_spill] sm:$0xff] %v3465_v33  ;;  %v3477_v57 = vsel %vm628_vm10, %v4376_v9, %v2324_v18  ;;  %v770_v18 = vsel %vm768_vm3, %v4488_v25, %v4487_v47  ;;  %v2349_v9 = vunpack.i.l.bf16 %v2348_v10  ;;  %v4490_v25 = vunpack.i.h.bf16 %v3098_v2 }
 0x246   : > { %v2333_v8 = vpop.permute.xlu0 %2332  ;;  %v3483_v59 = vpop.permute.xlu1 %2352  ;;  %v799_v53 = vpack.c.bf16 %v770_v18, %v770_v18  ;;  %v2350_v18 = vunpack.i.h.bf16 %v2348_v10 }
 0x247   : > { %v2334_v61 = vunpack.i.l.bf16 %v2333_v8  ;;  %869 = vrot.lane.b32.xlu1 %v795_v44, %s2643_s22  ;;  %v2335_v37 = vunpack.i.h.bf16 %v2333_v8  ;;  %v2355_v32 = vunpack.i.h.bf16 %v3483_v59  ;;  %v4381_v48 = vunpack.i.l.bf16 %v3483_v59 }
 0x248   : > { %2507 = vrot.lane.b32.xlu0 %v2506_v63, %s2657_s18  ;;  %v772_v47 = vsel %vm768_vm3, %v4490_v25, %v3224_v16  ;;  %v4512_v41 = vunpack.i.l.bf16 %v3483_v59 }
 0x249   : > { %v3498_v46 = vsel %vm1312_vm2, %v2330_v20, %v2334_v61  ;;  %v3507_v8 = vsel %vm1293_vm12, %v4381_v48, %v2355_v32  ;;  %v3513_v20 = vsel %vm768_vm3, %v4384_v3, %v2349_v9  ;;  %v801_v2 = vpack.c.bf16 %v772_v47, %v772_v47 }
 0x24a   : > { %4489 = vst [vmem:[#allocation37_spill] sm:$0xff] %v3498_v46  ;;  %v2343_v44 = vpop.permute.xlu0 %2342  ;;  %v2368_v38 = vpop.permute.xlu1 %2367  ;;  %4491 = vst [vmem:[#allocation38_spill] sm:$0xff] %v3513_v20  ;;  %v3518_v25 = vsel %vm1312_vm2, %v2334_v61, %v2335_v37  ;;  %vm1128_vm2 = vcmask 1014784  }
 0x24b   : > { %v2345_v51 = vunpack.i.h.bf16 %v2343_v44  ;;  %v2344_v63 = vunpack.i.l.bf16 %v2343_v44  ;;  %877 = vrot.lane.b32.xlu1 %v799_v53, %s2643_s22  ;;  %v2370_v33 = vunpack.i.h.bf16 %v2368_v38  ;;  %v2369_v44 = vunpack.i.l.bf16 %v2368_v38 }
 0x24c   : > { %v3533_v38 = vsel %vm768_vm3, %v2349_v9, %v2350_v18 }
 0x24d   : > { %v3521_v48 = vsel %vm1331_vm6, %v2340_v17, %v2344_v63  ;;  %v3524_v53 = vsel %vm1331_vm6, %v2344_v63, %v2345_v51  ;;  %4493 = vst [vmem:[#allocation40_spill] sm:$0xff] %v3533_v38  ;;  %v3536_v51 = vsel %vm768_vm3, %v2350_v18, %v2239_v58  ;;  %v3545_v16 = vsel %vm728_vm0, %v2369_v44, %v2370_v33 }
 0x24e   : > { %4492 = vst [vmem:[#allocation39_spill] sm:$0xff] %v3521_v48  ;;  %v2358_v47 = vpop.permute.xlu0 %2357  ;;  %v2378_v3 = vpop.permute.xlu1 %2377  ;;  %4494 = vst [vmem:[#allocation41_spill] sm:$0xff] %v3536_v51  ;;  %v2280_v33 = vunpack.i.h.bf16 %v3243_v11  ;;  %vm1220_vm6 = vcmask 850944  }
 0x24f   : > { %v2360_v61 = vunpack.i.h.bf16 %v2358_v47  ;;  %v2359_v37 = vunpack.i.l.bf16 %v2358_v47  ;;  %v2380_v20 = vunpack.i.h.bf16 %v2378_v3  ;;  %v2379_v17 = vunpack.i.l.bf16 %v2378_v3  ;;  %881 = vrot.lane.b32.xlu1 %v801_v2, %s2643_s22  ;;  %4497 = vst [vmem:[#allocation44_spill] sm:$0xff] %v3545_v16 }
 0x251   : > { %v3539_v63 = vsel %vm1293_vm12, %v2355_v32, %v2359_v37  ;;  %v3542_v10 = vsel %vm1293_vm12, %v2359_v37, %v2360_v61  ;;  %v3548_v47 = vsel %vm748_vm15, %v2379_v17, %v2380_v20  ;;  %v2279_v20 = vunpack.i.l.bf16 %v3243_v11 }
 0x252   : > { %4495 = vst [vmem:[#allocation42_spill] sm:$0xff] %v3539_v63  ;;  %4496 = vst [vmem:[#allocation43_spill] sm:$0xff] %v3542_v10  ;;  %v3552_v9 = vpop.permute.xlu0 %2362  ;;  %v3554_v2 = vpop.permute.xlu1 %2387  ;;  %v2255_v11 = vunpack.i.h.bf16 %v3181_v21 }
 0x253   : > { %4498 = vst [vmem:[#allocation45_spill] sm:$0xff] %v3548_v47  ;;  %v2365_v18 = vunpack.i.h.bf16 %v3552_v9  ;;  %2447 = vrot.lane.b32.xlu1 %v3057_v36, %s2655_s16  ;;  %v2364_v61 = vunpack.i.l.bf16 %v3552_v9  ;;  %v3578_v9 = vsel %vm668_vm11, %v3096_v1, %v2279_v20  ;;  %v2390_v1 = vunpack.i.h.bf16 %v3554_v2 }
 0x255   : > { %v3567_v37 = vsel %vm728_vm0, %v2365_v18, %v2369_v44  ;;  %v3581_v44 = vsel %vm668_vm11, %v2279_v20, %v2280_v33  ;;  %v3584_v63 = vsel %vm728_vm0, %v2364_v61, %v2365_v18  ;;  %v2284_v18 = vunpack.i.l.bf16 %v3320_v0 }
 0x256   : > { %4499 = vst [vmem:[#allocation46_spill] sm:$0xff] %v3567_v37  ;;  %v3569_v3 = vpop.permute.xlu0 %2372  ;;  %v2393_v58 = vpop.permute.xlu1 %2392  ;;  %4500 = vst [vmem:[#allocation47_spill] sm:$0xff] %v3584_v63 }
 0x257   : > { %v2375_v32 = vunpack.i.h.bf16 %v3569_v3  ;;  %v2374_v16 = vunpack.i.l.bf16 %v3569_v3  ;;  %v2395_v47 = vunpack.i.h.bf16 %v2393_v58  ;;  %v2394_v38 = vunpack.i.l.bf16 %v2393_v58  ;;  %2462 = vrot.lane.b32.xlu1 %v3046_v28, %s2647_s27 }
 0x259   : > { %v3587_v51 = vsel %vm748_vm15, %v2375_v32, %v2379_v17  ;;  %v3591_v3 = vsel %vm1128_vm2, %v3163_v39, %v2394_v38  ;;  %v3594_v58 = vsel %vm748_vm15, %v2374_v16, %v2375_v32  ;;  %v3597_v10 = vsel %vm1128_vm2, %v2394_v38, %v2395_v47 }
 0x25a   : > { %4501 = vst [vmem:[#allocation48_spill] sm:$0xff] %v3587_v51  ;;  %4502 = vst [vmem:[#allocation49_spill] sm:$0xff] %v3591_v3  ;;  %v2383_v20 = vpop.permute.xlu0 %2382  ;;  %v3603_v46 = vpop.permute.xlu1 %2407  ;;  %v2389_v32 = vunpack.i.l.bf16 %v3554_v2  ;;  %v4504_v3 = vunpack.i.l.bf16 %v3181_v21 }
 0x25b   : > { %4503 = vst [vmem:[#allocation50_spill] sm:$0xff] %v3597_v10  ;;  %v2385_v48 = vunpack.i.h.bf16 %v2383_v20  ;;  %v2384_v38 = vunpack.i.l.bf16 %v2383_v20  ;;  %2472 = vrot.lane.b32.xlu1 %v3046_v28, %s2656_s17  ;;  %v2629_v28 = vld [vmem:[#allocation2 + $0x8] sm:$0xff] }
 0x25c   : > { %v3617_v37 = vsel %vm1201_vm9, %v4504_v3, %v2255_v11  ;;  %v3650_v3 = vsel %vm668_vm11, %v2280_v33, %v2284_v18 }
 0x25d   : > { %4505 = vst [vmem:[#allocation51_spill] sm:$0xff] %v3617_v37  ;;  %v3621_v39 = vsel %vm1220_vm6, %v3179_v7, %v2384_v38  ;;  %v3624_v17 = vsel %vm1220_vm6, %v2385_v48, %v2389_v32  ;;  %v3627_v20 = vsel %vm1220_vm6, %v2384_v38, %v2385_v48  ;;  %v4508_v48 = vunpack.i.h.bf16 %v3320_v0  ;;  %4510 = vst [vmem:[#allocation55_spill] sm:$0xff] %v3650_v3 }
 0x25e   : > { %4506 = vst [vmem:[#allocation52_spill] sm:$0xff] %v3621_v39  ;;  %4507 = vst [vmem:[#allocation53_spill] sm:$0xff] %v3624_v17  ;;  %v2398_v21 = vpop.permute.xlu0 %2397  ;;  %v3633_v10 = vpop.permute.xlu1 %2417  ;;  %v3647_v17 = vpack.i.bf16 %v2629_v28, %v3012_v13 }
 0x25f   : > { %v2400_v7 = vunpack.i.h.bf16 %v2398_v21  ;;  %v2399_v51 = vunpack.i.l.bf16 %v2398_v21  ;;  %v2419_v63 = vunpack.i.l.bf16 %v3633_v10  ;;  %2482 = vrot.lane.b32.xlu1 %v3057_v36, %s2657_s18  ;;  %v3643_v38 = vsel %vm668_vm11, %v2284_v18, %v4508_v48 }
 0x260   : > { %4509 = vst [vmem:[#allocation54_spill] sm:$0xff] %v3643_v38  ;;  %v3683_v18 = vsel %vm1220_vm6, %v2389_v32, %v2390_v1  ;;  %v4516_v1 = vunpack.i.h.bf16 %v3265_v22  ;;  %vm1350_vm11 = vcmask 891904   ;;  %v2294_v22 = vunpack.i.l.bf16 %v3349_v60 }
 0x261   : > { %v3653_v21 = vsel %vm1128_vm2, %v2395_v47, %v2399_v51  ;;  %v3658_v36 = vsel %vm1293_vm12, %v2419_v63, %v4512_v41  ;;  %v3661_v48 = vsel %vm1128_vm2, %v2399_v51, %v2400_v7  ;;  %v4514_v41 = vunpack.i.h.bf16 %v3351_v42  ;;  %4515 = vst [vmem:[#allocation58_spill] sm:$0xff] %v3683_v18 }
 0x262   : > { %4511 = vst [vmem:[#allocation56_spill] sm:$0xff] %v3653_v21  ;;  %4513 = vst [vmem:[#allocation57_spill] sm:$0xff] %v3661_v48  ;;  %v3665_v39 = vpop.permute.xlu0 %2402  ;;  %v3667_v28 = vpop.permute.xlu1 %2422  ;;  %v3680_v63 = vsel %vm728_vm0, %v3161_v40, %v2364_v61  ;;  %v2409_v7 = vunpack.i.l.bf16 %v3603_v46 }
 0x263   : > { %v2404_v47 = vunpack.i.l.bf16 %v3665_v39  ;;  %v2424_v59 = vunpack.i.l.bf16 %v3667_v28  ;;  %2492 = vrot.lane.b32.xlu1 %v3647_v17, %s2658_s19  ;;  %v2501_v51 = vpack.i.bf16 %v2876_v55, %v4514_v41 }
 0x265   : > { %v2516_v2 = vpack.i.bf16 %v3239_v50, %v2404_v47  ;;  %v3688_v33 = vsel %vm1201_vm9, %v2255_v11, %v2404_v47  ;;  %v3691_v21 = vsel %vm748_vm15, %v2424_v59, %v2374_v16  ;;  %v2526_v11 = vpack.i.bf16 %v3234_v24, %v4516_v1 }
 0x266   : > { %v2413_v41 = vpop.permute.xlu0 %2412  ;;  %v2433_v48 = vpop.permute.xlu1 %2432  ;;  %v2295_v47 = vunpack.i.h.bf16 %v3349_v60  ;;  %v4517_v59 = vunpack.i.l.bf16 %v3201_v29  ;;  %v2511_v40 = vpack.i.bf16 %v3688_v33, %v3617_v37  ;;  %v2410_v1 = vunpack.i.h.bf16 %v3603_v46 }
 0x267   : > { %v2414_v61 = vunpack.i.l.bf16 %v2413_v41  ;;  %2502 = vrot.lane.b32.xlu1 %v2501_v51, %s2657_s18  ;;  %2517 = vrot.lane.b32.xlu0 %v2516_v2, %s2657_s18  ;;  %v2435_v16 = vunpack.i.h.bf16 %v2433_v48  ;;  %v2434_v32 = vunpack.i.l.bf16 %v2433_v48  ;;  %v4518_v51 = vunpack.i.l.bf16 %v3217_v49 }
 0x268   : > { %v3706_v42 = vsel %vm688_vm13, %v2409_v7, %v4517_v59  ;;  %v2415_v48 = vunpack.i.h.bf16 %v2413_v41  ;;  %v2290_v49 = vunpack.i.h.bf16 %v3267_v43  ;;  %v4519_v60 = vunpack.i.h.bf16 %v3278_v23 }
 0x269   : > { %v3713_v2 = vsel %vm708_vm14, %v2414_v61, %v4518_v51  ;;  %v1744_v41 = vsel %vm688_vm13, %v2434_v32, %v2435_v16  ;;  %v2521_v61 = vpack.i.bf16 %v3291_v6, %v3294_v56  ;;  %v1354_v55 = vsel %vm1350_vm11, %v2294_v22, %v2295_v47 }
 0x26a   : > { %v2428_v29 = vpop.permute.xlu0 %2427  ;;  %v2438_v18 = vpop.permute.xlu1 %2437  ;;  %v2536_v46 = vpack.i.bf16 %v3706_v42, %v4519_v60  ;;  %v2289_v37 = vunpack.i.l.bf16 %v3267_v43 }
 0x26b   : > { %v2430_v7 = vunpack.i.h.bf16 %v2428_v29  ;;  %v2429_v59 = vunpack.i.l.bf16 %v2428_v29  ;;  %v2440_v50 = vunpack.i.h.bf16 %v2438_v18  ;;  %v2439_v24 = vunpack.i.l.bf16 %v2438_v18  ;;  %2512 = vrot.lane.b32.xlu1 %v2511_v40, %s2657_s18  ;;  %2527 = vrot.lane.b32.xlu0 %v2526_v11, %s2657_s18 }
 0x26c   : > { %v1353_v11 = vsel %vm1350_vm11, %v2290_v49, %v2294_v22 }
 0x26d   : > { %v1741_v51 = vsel %vm688_vm13, %v2410_v1, %v2429_v59  ;;  %v1742_v29 = vsel %vm688_vm13, %v2429_v59, %v2430_v7  ;;  %v1743_v18 = vsel %vm688_vm13, %v2430_v7, %v2434_v32  ;;  %v1763_v40 = vsel %vm708_vm14, %v2415_v48, %v2439_v24  ;;  %v4521_v7 = vld [vmem:[#allocation22_spill] sm:$0xff] }
 0x26e   : > { %v1749_v23 = vmax.f32 %v2782_v27, %v1741_v51  ;;  %v1750_v60 = vmax.f32 %v2791_v30, %v1742_v29  ;;  %v2443_v16 = vpop.permute.xlu0 %2442  ;;  %v1764_v56 = vsel %vm708_vm14, %v2439_v24, %v2440_v50  ;;  %v1752_v32 = vmax.f32 %v2809_v35, %v1744_v41  ;;  %v4520_v30 = vld [vmem:[#allocation21_spill] sm:$0xff] }
 0x26f   : > { %v2445_v1 = vunpack.i.h.bf16 %v2443_v16  ;;  %v2444_v6 = vunpack.i.l.bf16 %v2443_v16  ;;  %2522 = vrot.lane.b32.xlu1 %v2521_v61, %s2657_s18  ;;  %2537 = vrot.lane.b32.xlu0 %v2536_v46, %s2657_s18  ;;  %v1751_v48 = vmax.f32 %v2802_v34, %v1743_v18  ;;  %v2531_v59 = vpack.i.bf16 %v4521_v7, %v4520_v30  ;;  %v4526_v16 = vld [vmem:[#allocation23_spill] sm:$0xff] }
 0x270   : > { %v3742_v22 = vmax.f32 %v1749_v23, %v1763_v40  ;;  %v3744_v27 = vmax.f32 %v1750_v60, %v1764_v56  ;;  %v2546_v43 = vpack.i.bf16 %v1354_v55, %v1353_v11  ;;  %v1352_v34 = vsel %vm1350_vm11, %v2289_v37, %v2290_v49  ;;  %v4523_v49 = vld [vmem:[#allocation14_spill] sm:$0xff] }
 0x271   : > { %v1765_v24 = vsel %vm708_vm14, %v2440_v50, %v2444_v6  ;;  %v1766_v51 = vsel %vm708_vm14, %v2444_v6, %v2445_v1  ;;  %v2556_v35 = vpack.i.bf16 %v3643_v38, %v3650_v3  ;;  %v2541_v55 = vpack.i.bf16 %v1352_v34, %v3713_v2 }
 0x272   : > { %v3750_v29 = vmax.f32 %v1751_v48, %v1765_v24  ;;  %v3752_v61 = vmax.f32 %v1752_v32, %v1766_v51  ;;  %v3754_v46 = vpop.permute.xlu0 %843  ;;  %v2551_v6 = vpack.i.bf16 %v3581_v44, %v2295_v47  ;;  %v2566_v56 = vpack.i.bf16 %v3451_v14, %v3578_v9  ;;  %v4528_v48 = vld [vmem:[#allocation24_spill] sm:$0xff] }
 0x273   : > { %2532 = vrot.lane.b32.xlu1 %v2531_v59, %s2657_s18  ;;  %2547 = vrot.lane.b32.xlu0 %v2546_v43, %s2657_s18  ;;  %v1351_v18 = vsel %vm1350_vm11, %v4523_v49, %v2289_v37  ;;  %v4524_v40 = vunpack.i.h.bf16 %v3320_v0  ;;  %v4525_v23 = vunpack.i.h.bf16 %v3280_v52  ;;  %v4527_v1 = vunpack.i.h.bf16 %v4526_v16  ;;  %v4529_v52 = vld [vmem:[#allocation25_spill] sm:$0xff]  ;;  %v4530_v51 = vld [vmem:[#allocation12_spill] sm:$0xff] }
 0x274   : > { %4522 = vst [vmem:[#allocation21_spill] sm:$0xff] %v3752_v61  ;;  %v2571_v37 = vpack.i.bf16 %v4528_v48, %v3440_v4  ;;  %v2581_v0 = vpack.i.bf16 %v4529_v52, %v3426_v15  ;;  %v2319_v43 = vunpack.i.l.bf16 %v3448_v45  ;;  %v2591_v34 = vpack.i.bf16 %v4530_v51, %v3420_v19  ;;  %v4535_v16 = vld [vmem:[#allocation13_spill] sm:$0xff] }
 0x275   : > { %v2561_v11 = vpack.i.bf16 %v1351_v18, %v4524_v40  ;;  %v2576_v60 = vpack.i.bf16 %v3423_v31, %v4525_v23  ;;  %v2586_v32 = vpack.i.bf16 %v3412_v62, %v4527_v1  ;;  %v4534_v18 = vld [vmem:[#allocation9_spill] sm:$0xff]  ;;  %v3824_v23 = vpop.permute.xlu1 %853  ;;  %v1918_v1 = vld [vmem:[%s4324_s9] sm:$0xff]  ;;  %vm1896_vm14 = vcmask 531456  }
 0x276   : > { %v3762_v50 = vpop.permute.xlu0 %863 }
 0x277   : > { %2542 = vrot.lane.b32.xlu1 %v2541_v55, %s2657_s18  ;;  %2557 = vrot.lane.b32.xlu0 %v2556_v35, %s2657_s18  ;;  %v4531_v35 = vunpack.i.h.bf16 %v3448_v45 }
 0x279   : > { %v3805_v55 = vsel %vm628_vm10, %v2319_v43, %v4531_v35 }
 0x27a   : > { %v3769_v41 = vpop.permute.xlu0 %835  ;;  %v2596_v40 = vpack.i.bf16 %v3805_v55, %v4534_v18 }
 0x27b   : > { %2552 = vrot.lane.b32.xlu1 %v2551_v6, %s2657_s18  ;;  %2567 = vrot.lane.b32.xlu0 %v2566_v56, %s2657_s18  ;;  %v4532_v6 = vld [vmem:[#allocation15_spill] sm:$0xff] }
 0x27c   : > { %v3809_v56 = vsel %vm628_vm10, %v4532_v6, %v2319_v43  ;;  %vm922_vm10 = vcmask 588800  }
 0x27d   : > { %v2616_v45 = vpack.i.bf16 %v3012_v13, %v3809_v56 }
 0x27e   : > { %v3780_v47 = vpop.permute.xlu0 %839 }
 0x27f   : > { %2562 = vrot.lane.b32.xlu1 %v2561_v11, %s2657_s18  ;;  %2577 = vrot.lane.b32.xlu0 %v2576_v60, %s2657_s18 }
 0x282   : > { %v3789_v59 = vpop.permute.xlu0 %847 }
 0x283   : > { %2572 = vrot.lane.b32.xlu1 %v2571_v37, %s2657_s18  ;;  %2587 = vrot.lane.b32.xlu0 %v2586_v32, %s2657_s18  ;;  %v874_v32 = vpop.permute.xlu1 %873  ;;  %v1571_v37 = vld [vmem:[%s4322_s7] sm:$0xff] }
 0x286   : > { %v3796_v24 = vpop.permute.xlu0 %851 }
 0x287   : > { %2582 = vrot.lane.b32.xlu1 %v2581_v0, %s2657_s18  ;;  %2602 = vrot.lane.b32.xlu0 %v3647_v17, %s2659_s20  ;;  %v4533_v17 = vpack.i.bf16 %v3472_v54, %v3477_v57 }
 0x28a   : > { %v3811_v49 = vpop.permute.xlu0 %855 }
 0x28b   : > { %2592 = vrot.lane.b32.xlu1 %v2591_v34, %s2657_s18  ;;  %2612 = vrot.lane.b32.xlu0 %v4533_v17, %s2657_s18 }
 0x28e   : > { %v3822_v11 = vpop.permute.xlu0 %859 }
 0x28f   : > { %2597 = vrot.lane.b32.xlu1 %v2596_v40, %s2657_s18  ;;  %2617 = vrot.lane.b32.xlu0 %v2616_v45, %s2657_s18 }
 0x292   : > { %v868_v60 = vpop.permute.xlu0 %867 }
 0x293   : > { %1871 = vrot.lane.b32.xlu1 %v4535_v16, %s2658_s19  ;;  %1894 = vrot.lane.b32.xlu0 %v4535_v16, %s2659_s20 }
 0x296   : > { %v872_v13 = vpop.permute.xlu0 %871 }
 0x297   : > { %2607 = vrot.lane.b32.xlu1 %v3382_v12, %s2659_s20  ;;  %1921 = vperm.xlu0 %2154, %v1918_v1  }
 0x299   : > { %v884_v0 = vpop.permute.xlu1 %883 }
 0x29a   : > { %v876_v43 = vpop.permute.xlu0 %875 }
 0x29b   : > { %1574 = vperm.xlu1 %2155, %v1571_v37  }
 0x29d   : > { %v3838_v34 = vpop.permute.xlu1 %837 }
 0x29e   : > { %v880_v35 = vpop.permute.xlu0 %879 }
 0x2a1   : > { %v3840_v6 = vpop.permute.xlu1 %841 }
 0x2a2   : > { %v2453_v17 = vpop.permute.xlu0 %2452 }
 0x2a3   : > { %v2455_v18 = vunpack.i.h.bf16 %v2453_v17  ;;  %v2454_v40 = vunpack.i.l.bf16 %v2453_v17 }
 0x2a5   : > { %v3843_v45 = vsel %vm1201_vm9, %v2454_v40, %v2455_v18  ;;  %v846_v12 = vpop.permute.xlu1 %845 }
 0x2a6   : > { %4536 = vst [vmem:[#allocation22_spill] sm:$0xff] %v3843_v45  ;;  %v3849_v48 = vpop.permute.xlu0 %2457 }
 0x2a9   : > { %v3847_v1 = vpop.permute.xlu1 %849 }
 0x2aa   : > { %v3851_v3 = vpop.permute.xlu0 %2467 }
 0x2ad   : > { %v858_v4 = vpop.permute.xlu1 %857 }
 0x2ae   : > { %v3860_v14 = vpop.permute.xlu0 %2477 }
 0x2b1   : > { %v862_v15 = vpop.permute.xlu1 %861 }
 0x2b5   : > { %v866_v37 = vpop.permute.xlu1 %865 }
 0x2b6   : > { %v898_v31 = vsel %vm688_vm13, %v866_v37, %v868_v60 }
 0x2b9   : > { %v870_v52 = vpop.permute.xlu1 %869 }
 0x2ba   : > { %v899_v16 = vsel %vm688_vm13, %v868_v60, %v870_v52 }
 0x2bd   : > { %v878_v62 = vpop.permute.xlu1 %877 }
 0x2be   : > { %v902_v17 = vsel %vm688_vm13, %v876_v43, %v878_v62  ;;  %v903_v18 = vsel %vm688_vm13, %v878_v62, %v880_v35  ;;  %v895_v62 = vsel %vm688_vm13, %v858_v4, %v3822_v11 }
 0x2bf   : > { %v927_v19 = vsel %vm421_vm1, %v902_v17, 0  ;;  %2106 = vmatprep.subr.msk.bf16.mxu0 %vm421_vm1, %v903_v18  ;;  %v2420_v18 = vunpack.i.h.bf16 %v3633_v10 }
 0x2c0   : > { %945 = vmatpush1.bf16.msra.mxu0 %v927_v19  ;;  %v901_v19 = vsel %vm688_vm13, %v872_v13, %v874_v32  ;;  %v891_v32 = vsel %vm688_vm13, %v3789_v59, %v3847_v1 }
 0x2c1   : > { %v882_v45 = vpop.permute.xlu1 %881  ;;  %946 = vmatprep.subr.bf16.mxu0 %v899_v16 }
 0x2c2   : > { %v904_v61 = vsel %vm688_vm13, %v880_v35, %v882_v45  ;;  %v905_v38 = vsel %vm688_vm13, %v882_v45, %v884_v0  ;;  %v2405_v0 = vunpack.i.h.bf16 %v3665_v39  ;;  %v2459_v35 = vunpack.i.l.bf16 %v3849_v48 }
 0x2c3   : > { %v933_v43 = vsel %vm421_vm1, %v904_v61, 0  ;;  %2108 = vmatprep.subr.msk.bf16.mxu1 %vm421_vm1, %v905_v38  ;;  %v900_v38 = vsel %vm688_vm13, %v870_v52, %v872_v13  ;;  %v2425_v45 = vunpack.i.h.bf16 %v3667_v28  ;;  %v2469_v52 = vunpack.i.l.bf16 %v3851_v3 }
 0x2c4   : > { %947 = vmatpush1.bf16.msra.mxu0 %v898_v31  ;;  %986 = vmatpush1.bf16.msra.mxu1 %v933_v43  ;;  %v894_v31 = vsel %vm688_vm13, %v3811_v49, %v858_v4  ;;  %v897_v4 = vsel %vm688_vm13, %v862_v15, %v3762_v50  ;;  %v3892_v49 = vpop.permute.xlu0 %2487  ;;  %v890_v50 = vsel %vm688_vm13, %v846_v12, %v3789_v59 }
 0x2c5   : > { %v3868_v16 = vpop.permute.xlu1 %2447  ;;  %948 = vmatprep.subr.bf16.mxu0 %v895_v62  ;;  %987 = vmatprep.subr.bf16.mxu1 %v901_v19  ;;  %v896_v43 = vsel %vm688_vm13, %v3822_v11, %v862_v15  ;;  %v887_v62 = vsel %vm688_vm13, %v3838_v34, %v3780_v47  ;;  %v893_v19 = vsel %vm688_vm13, %v3796_v24, %v3824_v23 }
 0x2c6   : > { %v2450_v60 = vunpack.i.h.bf16 %v3868_v16  ;;  %v2449_v61 = vunpack.i.l.bf16 %v3868_v16  ;;  %v3918_v10 = vsel %vm1293_vm12, %v2420_v18, %v2469_v52  ;;  %v886_v11 = vsel %vm688_vm13, %v3769_v41, %v3838_v34  ;;  %v803_v41 = vld [vmem:[%s4319_s4] sm:$0xf] }
 0x2c7   : > { %v892_v23 = vsel %vm688_vm13, %v3847_v1, %v3796_v24  ;;  %v4537_v24 = vld [vmem:[#allocation36_spill] sm:$0xff]  ;;  %v4538_v1 = vld [vmem:[#allocation35_spill] sm:$0xff] }
 0x2c8   : > { %v1785_v39 = vsel %vm1201_vm9, %v2405_v0, %v2449_v61  ;;  %v3887_v37 = vsel %vm1201_vm9, %v2450_v60, %v2454_v40  ;;  %949 = vmatpush1.bf16.msra.mxu0 %v894_v31  ;;  %988 = vmatpush1.bf16.msra.mxu1 %v900_v38  ;;  %v1807_v40 = vsel %vm748_vm15, %v2425_v45, %v2459_v35  ;;  %v3930_v12 = vpop.permute.xlu0 %2497  ;;  %v3935_v0 = vld [vmem:[%s4321_s6] sm:$0xff]  ;;  %v2240_v45 = vunpack.i.h.bf16 %v3199_v5 }
 0x2c9   : > { %v1793_v28 = vmax.f32 %v3742_v22, %v1785_v39  ;;  %v1795_v13 = vmax.f32 %v3750_v29, %v3887_v37  ;;  %v3897_v17 = vpop.permute.xlu1 %2462  ;;  %950 = vmatprep.subr.bf16.mxu0 %v891_v32  ;;  %989 = vmatprep.subr.bf16.mxu1 %v897_v4  ;;  %v889_v31 = vsel %vm688_vm13, %v3840_v6, %v3754_v46  ;;  %v4540_v39 = vld [vmem:[#allocation31_spill] sm:$0xff]  ;;  %v4541_v4 = vld [vmem:[#allocation33_spill] sm:$0xff]  ;;  %v4545_v5 = vld [vmem:[#allocation38_spill] sm:$0xff] }
 0x2ca   : > { %v4539_v38 = vpack.c.bf16 %v4537_v24, %v4538_v1  ;;  %v2111_v32 = vcombine.high %v3935_v0, %v3935_v0  ;;  %v888_v46 = vsel %vm688_vm13, %v3780_v47, %v3840_v6  ;;  %v4547_v47 = vpack.c.bf16 %v3524_v53, %v3518_v25  ;;  %v4554_v25 = vld [vmem:[#allocation41_spill] sm:$0xff]  ;;  %v4602_v37 = vld [vmem:[#allocation55_spill] sm:$0xff] }
 0x2cb   : > { %v3907_v22 = vmax.f32 %v1793_v28, %v1807_v40  ;;  %v4542_v28 = vpack.c.bf16 %v4540_v39, %v4541_v4  ;;  %v4543_v40 = vld [vmem:[#allocation16_spill] sm:$0xff]  ;;  %vm1445_vm13 = vcmask 547840  }
 0x2cc   : > { %951 = vmatpush1.bf16.msra.mxu0 %v890_v50  ;;  %990 = vmatpush1.bf16.msra.mxu1 %v896_v43  ;;  %v4544_v18 = vunpack.i.h.bf16 %v4543_v40  ;;  %v3961_v43 = vpop.permute.xlu0 %2507  ;;  %v4562_v40 = vld [vmem:[#allocation44_spill] sm:$0xff] }
 0x2cd   : > { %v3920_v59 = vpop.permute.xlu1 %2472  ;;  %952 = vmatprep.subr.bf16.mxu0 %v887_v62  ;;  %991 = vmatprep.subr.bf16.mxu1 %v893_v19  ;;  %v1837_v15 = vmax.f32 %v3907_v22, %v3918_v10  ;;  %v4546_v19 = vpack.c.bf16 %v3507_v8, %v4545_v5  ;;  %v4551_v8 = vld [vmem:[#allocation47_spill] sm:$0xff]  ;;  %v4565_v5 = vld [vmem:[#allocation26_spill] sm:$0xff] }
 0x2ce   : > { %v1275_v50 = vsel %vm768_vm3, %v2240_v45, %v4544_v18  ;;  %v4552_v1 = vpack.c.bf16 %v3594_v58, %v4551_v8  ;;  %v4557_v45 = vld [vmem:[#allocation42_spill] sm:$0xff]  ;;  %v4560_v58 = vpack.c.bf16 %v3627_v20, %v3435_v26  ;;  %v4570_v20 = vld [vmem:[#allocation17_spill] sm:$0xff] }
 0x2cf   : > { %v1542_v6 = vpack.c.bf16 %v3658_v36, %v1275_v50  ;;  %v4573_v8 = vld [vmem:[#allocation58_spill] sm:$0xff] }
 0x2d0   : > { %953 = vmatpush1.bf16.msra.mxu0 %v886_v11  ;;  %992 = vmatpush1.bf16.msra.mxu1 %v892_v23  ;;  %v4548_v11 = vld [vmem:[#allocation39_spill] sm:$0xff]  ;;  %v4549_v23 = vld [vmem:[#allocation37_spill] sm:$0xff] }
 0x2d1   : > { %v3943_v34 = vpop.permute.xlu1 %2482  ;;  %993 = vmatprep.subr.bf16.mxu1 %v889_v31  ;;  %1598 = vmatprep.subr.bf16.mxu0 %v4539_v38  ;;  %v4550_v31 = vpack.c.bf16 %v4548_v11, %v4549_v23  ;;  %v4553_v38 = vld [vmem:[#allocation43_spill] sm:$0xff]  ;;  %v2509_v11 = vunpack.i.l.bf16 %v3961_v43  ;;  %v4571_v23 = vld [vmem:[#allocation18_spill] sm:$0xff] }
 0x2d2   : > { %v4555_v53 = vpack.c.bf16 %v4553_v38, %v4554_v25  ;;  %v4575_v25 = vld [vmem:[#allocation8_spill] sm:$0xff] }
 0x2d3   : > { %2107 = vmatmul.mubr.msk.bf16.vlgmr.msra.gmra.mxu0 %vm922_vm10, %v803_v41 }
 0x2d4   : > { %994 = vmatpush1.bf16.msra.mxu1 %v888_v46  ;;  %1599 = vmatpush1.bf16.msra.mxu0 %v4542_v28  ;;  %v4558_v46 = vld [vmem:[#allocation40_spill] sm:$0xff]  ;;  %v4561_v28 = vld [vmem:[#allocation45_spill] sm:$0xff] }
 0x2d5   : > { %v3963_v62 = vpop.permute.xlu1 %2492  ;;  %1600 = vmatprep.subr.bf16.mxu0 %v4546_v19  ;;  %1639 = vmatprep.subr.bf16.mxu1 %v4547_v47  ;;  %v4559_v39 = vpack.c.bf16 %v4557_v45, %v4558_v46  ;;  %v4563_v18 = vpack.c.bf16 %v4561_v28, %v4562_v40  ;;  %v4568_v19 = vld [vmem:[#allocation46_spill] sm:$0xff]  ;;  %v4577_v46 = vld [vmem:[#allocation11_spill] sm:$0xff]  ;;  %v2465_v28 = vunpack.i.h.bf16 %v3897_v17  ;;  %v4578_v40 = vpack.c.bf16 %v3713_v2, %v3706_v42 }
 0x2d6   : > { %2113 = vmatprep.mubr.msk.bf16.mxu0 %vm922_vm10, %v2111_v32  ;;  %v4584_v42 = vld [vmem:[#allocation19_spill] sm:$0xff] }
 0x2d7   : > { %2109 = vmatmul.mubr.msk.bf16.vlgmr.msra.gmra.mxu1 %vm922_vm10, %v803_v41  ;;  %v4556_v41 = vpack.c.bf16 %v3691_v21, %v3680_v63  ;;  %v4567_v63 = vld [vmem:[#allocation48_spill] sm:$0xff]  ;;  %v4585_v2 = vpack.c.bf16 %v4521_v7, %v4584_v42 }
 0x2d8   : > { %1601 = vmatpush1.bf16.msra.mxu0 %v1542_v6  ;;  %1640 = vmatpush1.bf16.msra.mxu1 %v4550_v31  ;;  %v4569_v47 = vpack.c.bf16 %v4567_v63, %v4568_v19  ;;  %v2510_v6 = vunpack.i.h.bf16 %v3961_v43  ;;  %v4572_v31 = vpack.c.bf16 %v4570_v20, %v4571_v23  ;;  %v2460_v43 = vunpack.i.h.bf16 %v3849_v48  ;;  %v4588_v48 = vld [vmem:[#allocation20_spill] sm:$0xff] }
 0x2d9   : > { %v3977_v24 = vpop.permute.xlu1 %2502  ;;  %1602 = vmatprep.subr.bf16.mxu0 %v4552_v1  ;;  %1641 = vmatprep.subr.bf16.mxu1 %v4555_v53  ;;  %v3985_v36 = vpop.permute.xlu0 %2517  ;;  %v4574_v1 = vpack.c.bf16 %v4573_v8, %v3688_v33  ;;  %v1518_v53 = vpack.c.bf16 %v3809_v56, %v4575_v25  ;;  %v2464_v33 = vunpack.i.l.bf16 %v3897_v17  ;;  %v2480_v63 = vunpack.i.h.bf16 %v3860_v14  ;;  %v4582_v17 = vld [vmem:[#allocation50_spill] sm:$0xff] }
 0x2da   : > { %2115 = vmatprep.mubr.msk.bf16.mxu1 %vm922_vm10, %v2111_v32  ;;  %v4564_v32 = vld [vmem:[#allocation52_spill] sm:$0xff]  ;;  %v2479_v19 = vunpack.i.l.bf16 %v3860_v14  ;;  %v4583_v23 = vpack.c.bf16 %v3581_v44, %v4582_v17  ;;  %v1786_v8 = vsel %vm1201_vm9, %v2449_v61, %v2450_v60  ;;  %v2474_v44 = vunpack.i.l.bf16 %v3920_v59  ;;  %v4586_v61 = vld [vmem:[#allocation49_spill] sm:$0xff] }
 0x2db   : > { %v4566_v21 = vpack.c.bf16 %v4564_v32, %v4565_v5  ;;  %v4580_v32 = vld [vmem:[#allocation51_spill] sm:$0xff]  ;;  %v1808_v7 = vsel %vm748_vm15, %v2459_v35, %v2460_v43  ;;  %v1809_v16 = vsel %vm748_vm15, %v2460_v43, %v2464_v33  ;;  %v1810_v60 = vsel %vm748_vm15, %v2464_v33, %v2465_v28  ;;  %v4590_v28 = vld [vmem:[#allocation29_spill] sm:$0xff] }
 0x2dc   : > { %1603 = vmatpush1.bf16.msra.mxu0 %v4556_v41  ;;  %1642 = vmatpush1.bf16.msra.mxu1 %v4559_v39  ;;  %v4576_v41 = vld [vmem:[#allocation10_spill] sm:$0xff]  ;;  %v1521_v39 = vpack.c.bf16 %v3472_v54, %v4577_v46  ;;  %v2500_v17 = vunpack.i.h.bf16 %v3930_v12  ;;  %vm1873_vm15 = vcmask 539648  }
 0x2dd   : > { %v3994_v4 = vpop.permute.xlu1 %2512  ;;  %1604 = vmatprep.subr.bf16.mxu0 %v4560_v58  ;;  %1643 = vmatprep.subr.bf16.mxu1 %v4563_v18  ;;  %v4002_v50 = vpop.permute.xlu0 %2527  ;;  %v1520_v45 = vpack.c.bf16 %v3477_v57, %v4576_v41  ;;  %v2470_v58 = vunpack.i.h.bf16 %v3851_v3  ;;  %v4579_v18 = vld [vmem:[#allocation53_spill] sm:$0xff] }
 0x2de   : > { %v4581_v5 = vpack.c.bf16 %v4579_v18, %v4580_v32  ;;  %v4587_v18 = vpack.c.bf16 %v3578_v9, %v4586_v61  ;;  %v1794_v9 = vmax.f32 %v3744_v27, %v1786_v8  ;;  %v4593_v32 = vld [vmem:[#allocation54_spill] sm:$0xff]  ;;  %v4594_v3 = vld [vmem:[#allocation57_spill] sm:$0xff] }
 0x2df   : > { %v4597_v8 = vld [vmem:[#allocation22_spill] sm:$0xff] }
 0x2e0   : > { %1605 = vmatpush1.bf16.msra.mxu0 %v4566_v21  ;;  %1644 = vmatpush1.bf16.msra.mxu1 %v4569_v47  ;;  %v1519_v21 = vpack.c.bf16 %v3805_v55, %v4530_v51  ;;  %v2490_v47 = vunpack.i.h.bf16 %v3892_v49  ;;  %v1478_v51 = vsel %vm1445_vm13, %v2509_v11, %v2510_v6  ;;  %v2489_v55 = vunpack.i.l.bf16 %v3892_v49 }
 0x2e1   : > { %v4012_v26 = vpop.permute.xlu1 %2522  ;;  %1606 = vmatprep.subr.bf16.mxu0 %v4572_v31  ;;  %1645 = vmatprep.subr.bf16.mxu1 %v4574_v1  ;;  %v4020_v38 = vpop.permute.xlu0 %2537  ;;  %v2475_v1 = vunpack.i.h.bf16 %v3920_v59  ;;  %v2514_v11 = vunpack.i.l.bf16 %v3994_v4  ;;  %v4069_v49 = vcombine.low %v3935_v0, %v3935_v0  ;;  %v4589_v59 = vpack.c.bf16 %v4520_v30, %v4588_v48  ;;  %v4591_v30 = vld [vmem:[#allocation34_spill] sm:$0xff] }
 0x2e2   : > { %v1566_v35 = vpack.c.bf16 %v1478_v51, %v1478_v51  ;;  %v4089_v0 = vsel %vm1445_vm13, %v2479_v19, %v2480_v63  ;;  %v4592_v33 = vpack.c.bf16 %v4590_v28, %v4591_v30  ;;  %v4110_v27 = vsel %vm1445_vm13, %v2489_v55, %v2490_v47  ;;  %v4596_v51 = vld [vmem:[#allocation21_spill] sm:$0xff]  ;;  %v4600_v28 = vld [vmem:[#allocation27_spill] sm:$0xff] }
 0x2e3   : > { %v4107_v42 = vsel %vm1293_vm12, %v2474_v44, %v2475_v1  ;;  %v4598_v61 = vmax.f32 %v4596_v51, %v4597_v8  ;;  %v2485_v48 = vunpack.i.h.bf16 %v3943_v34  ;;  %v2519_v1 = vunpack.i.l.bf16 %v3985_v36 }
 0x2e4   : > { %1607 = vmatpush1.bf16.msra.mxu0 %v4578_v40  ;;  %1646 = vmatpush1.bf16.msra.mxu1 %v4581_v5  ;;  %v2515_v40 = vunpack.i.h.bf16 %v3994_v4  ;;  %v4082_v4 = vsel %vm1293_vm12, %v2469_v52, %v2470_v58  ;;  %v4595_v5 = vpack.c.bf16 %v4593_v32, %v4594_v3  ;;  %v4134_v30 = vmax.f32 %v1794_v9, %v1808_v7  ;;  %v4606_v3 = vld [vmem:[#allocation24_spill] sm:$0xff] }
 0x2e5   : > { %v4043_v20 = vpop.permute.xlu1 %2532  ;;  %1608 = vmatprep.subr.bf16.mxu0 %v4583_v23  ;;  %1647 = vmatprep.subr.bf16.mxu1 %v4585_v2  ;;  %v4051_v31 = vpop.permute.xlu0 %2547  ;;  %v4104_v23 = vsel %vm1293_vm12, %v2470_v58, %v2474_v44  ;;  %v4115_v2 = vmax.f32 %v1795_v13, %v1809_v16  ;;  %v1479_v44 = vsel %vm1445_vm13, %v2510_v6, %v2514_v11  ;;  %v4603_v13 = vld [vmem:[#allocation56_spill] sm:$0xff]  ;;  %v2484_v32 = vunpack.i.l.bf16 %v3943_v34 }
 0x2e6   : > { %v1480_v58 = vsel %vm1445_vm13, %v2514_v11, %v2515_v40  ;;  %v2534_v47 = vunpack.i.l.bf16 %v4043_v20  ;;  %v4604_v16 = vpack.c.bf16 %v4602_v37, %v4603_v13  ;;  %v4605_v11 = vld [vmem:[#allocation25_spill] sm:$0xff]  ;;  %v1481_v7 = vsel %vm1445_vm13, %v2515_v40, %v2519_v1  ;;  %v4609_v1 = vld [vmem:[#allocation32_spill] sm:$0xff] }
 0x2e7   : > { %v2524_v9 = vunpack.i.l.bf16 %v4012_v26  ;;  %v2520_v37 = vunpack.i.h.bf16 %v3985_v36  ;;  %v2535_v13 = vunpack.i.h.bf16 %v4043_v20  ;;  %v2539_v36 = vunpack.i.l.bf16 %v4020_v38 }
 0x2e8   : > { %1609 = vmatpush1.bf16.msra.mxu0 %v4587_v18  ;;  %1648 = vmatpush1.bf16.msra.mxu1 %v4589_v59  ;;  %v4120_v18 = vmax.f32 %v4598_v61, %v1810_v60  ;;  %v4599_v59 = vld [vmem:[#allocation28_spill] sm:$0xff]  ;;  %v1587_v60 = vsel %vm421_vm1, %v1566_v35, 0  ;;  %v2530_v35 = vunpack.i.h.bf16 %v4002_v50  ;;  %v1568_v61 = vpack.c.bf16 %v1480_v58, %v1480_v58  ;;  %v4608_v58 = vld [vmem:[#allocation30_spill] sm:$0xff] }
 0x2e9   : > { %v4092_v43 = vpop.permute.xlu1 %2542  ;;  %1610 = vmatprep.subr.bf16.mxu0 %v4592_v33  ;;  %1649 = vmatprep.subr.bf16.mxu1 %v4595_v5  ;;  %v4100_v52 = vpop.permute.xlu0 %2557  ;;  %v4601_v29 = vpack.c.bf16 %v4599_v59, %v4600_v28  ;;  %v1839_v33 = vmax.f32 %v4115_v2, %v4104_v23  ;;  %v4607_v5 = vpack.c.bf16 %v4605_v11, %v4606_v3  ;;  %v2525_v28 = vunpack.i.h.bf16 %v4012_v26 }
 0x2ea   : > { %v1840_v8 = vmax.f32 %v4120_v18, %v4107_v42  ;;  %v1567_v59 = vpack.c.bf16 %v1479_v44, %v1479_v44  ;;  %v1569_v44 = vpack.c.bf16 %v1481_v7, %v1481_v7  ;;  %v2529_v26 = vunpack.i.l.bf16 %v4002_v50 }
 0x2eb   : > { %v2540_v11 = vunpack.i.h.bf16 %v4020_v38  ;;  %v2545_v25 = vunpack.i.h.bf16 %v4092_v43  ;;  %v1471_v3 = vsel %vm1445_vm13, %v2520_v37, %v2524_v9  ;;  %v1593_v50 = vsel %vm421_vm1, %v1568_v61, 0 }
 0x2ec   : > { %1611 = vmatpush1.bf16.msra.mxu0 %v4601_v29  ;;  %1650 = vmatpush1.bf16.msra.mxu1 %v4604_v16  ;;  %v2544_v29 = vunpack.i.l.bf16 %v4092_v43  ;;  %v4610_v16 = vpack.c.bf16 %v4608_v58, %v4609_v1  ;;  %v2549_v54 = vunpack.i.l.bf16 %v4051_v31  ;;  %v1477_v43 = vsel %vm1445_vm13, %v2535_v13, %v2539_v36 }
 0x2ed   : > { %v4139_v6 = vpop.permute.xlu1 %2552  ;;  %1612 = vmatprep.subr.bf16.mxu0 %v1519_v21  ;;  %1651 = vmatprep.subr.bf16.mxu1 %v4607_v5  ;;  %v4144_v51 = vpop.permute.xlu0 %2567  ;;  %v4154_v21 = vsel %vm1445_vm13, %v2485_v48, %v2489_v55  ;;  %v1475_v55 = vsel %vm1445_vm13, %v2530_v35, %v2534_v47  ;;  %v1472_v5 = vsel %vm1445_vm13, %v2524_v9, %v2525_v28  ;;  %v2560_v57 = vunpack.i.h.bf16 %v4100_v52 }
 0x2ee   : > { %v2555_v40 = vunpack.i.h.bf16 %v4139_v6  ;;  %v1474_v38 = vsel %vm1445_vm13, %v2544_v29, %v2530_v35  ;;  %v1563_v58 = vpack.c.bf16 %v1475_v55, %v1471_v3  ;;  %v1470_v61 = vsel %vm1445_vm13, %v2540_v11, %v2520_v37 }
 0x2ef   : > { %v1476_v9 = vsel %vm1445_vm13, %v2534_v47, %v2535_v13  ;;  %v2554_v35 = vunpack.i.l.bf16 %v4139_v6  ;;  %v1463_v41 = vsel %vm1445_vm13, %v2545_v25, %v2549_v54  ;;  %v2550_v37 = vunpack.i.h.bf16 %v4051_v31 }
 0x2f0   : > { %1613 = vmatpush1.bf16.msra.mxu0 %v1518_v53  ;;  %1652 = vmatpush1.bf16.msra.mxu1 %v4610_v16  ;;  %v2559_v53 = vunpack.i.l.bf16 %v4100_v52  ;;  %v2495_v16 = vunpack.i.h.bf16 %v3963_v62  ;;  %v1564_v55 = vpack.c.bf16 %v1476_v9, %v1472_v5  ;;  %v2570_v52 = vunpack.i.h.bf16 %v4144_v51 }
 0x2f1   : > { %v2563_v20 = vpop.permute.xlu1 %2562  ;;  %1653 = vmatprep.subr.bf16.mxu1 %v1521_v39  ;;  %v4174_v56 = vpop.permute.xlu0 %2577  ;;  %2112 = vmatprep.subr.msk.bf16.mxu0 %vm421_vm1, %v1567_v59  ;;  %v2569_v59 = vunpack.i.l.bf16 %v4144_v51  ;;  %v1464_v9 = vsel %vm1445_vm13, %v2549_v54, %v2550_v37  ;;  %v2504_v54 = vunpack.i.l.bf16 %v3977_v24  ;;  %v1838_v10 = vmax.f32 %v4134_v30, %v4082_v4 }
 0x2f2   : > { %v2565_v7 = vunpack.i.h.bf16 %v2563_v20  ;;  %v2564_v46 = vunpack.i.l.bf16 %v2563_v20  ;;  %v1467_v39 = vsel %vm1445_vm13, %v2555_v40, %v2559_v53  ;;  %v1465_v20 = vsel %vm1445_vm13, %v2550_v37, %v2554_v35 }
 0x2f3   : > { %v1559_v13 = vpack.c.bf16 %v1467_v39, %v1463_v41  ;;  %v1466_v36 = vsel %vm1445_vm13, %v2569_v59, %v2555_v40  ;;  %v2579_v40 = vunpack.i.l.bf16 %v4174_v56  ;;  %v1862_v23 = vmax.f32 %v1840_v8, %v4110_v27 }
 0x2f4   : > { %1621 = vmatpush2.bf16.msra.mxu0 %v1587_v60  ;;  %1654 = vmatpush1.bf16.msra.mxu1 %v1520_v45  ;;  %v1562_v60 = vpack.c.bf16 %v1474_v38, %v1470_v61  ;;  %v1473_v45 = vsel %vm1445_vm13, %v2525_v28, %v2529_v26  ;;  %v1462_v47 = vsel %vm1445_vm13, %v2565_v7, %v2545_v25  ;;  %v2580_v28 = vunpack.i.h.bf16 %v4174_v56 }
 0x2f5   : > { %v2573_v29 = vpop.permute.xlu1 %2572  ;;  %v2588_v1 = vpop.permute.xlu0 %2587  ;;  %1622 = vmatprep.subr.bf16.mxu0 %v1563_v58  ;;  %2114 = vmatprep.subr.msk.bf16.mxu1 %vm421_vm1, %v1569_v44  ;;  %v1565_v6 = vpack.c.bf16 %v1477_v43, %v1473_v45  ;;  %v1469_v44 = vsel %vm1445_vm13, %v2560_v57, %v2564_v46  ;;  %v1558_v25 = vpack.c.bf16 %v1466_v36, %v1462_v47  ;;  %v2505_v61 = vunpack.i.h.bf16 %v3977_v24 }
 0x2f6   : > { %v2574_v11 = vunpack.i.l.bf16 %v2573_v29  ;;  %v2575_v3 = vunpack.i.h.bf16 %v2573_v29  ;;  %v1468_v7 = vsel %vm1445_vm13, %v2559_v53, %v2560_v57  ;;  %v2589_v51 = vunpack.i.l.bf16 %v2588_v1 }
 0x2f7   : > { %v1561_v58 = vpack.c.bf16 %v1469_v44, %v1465_v20  ;;  %v2590_v46 = vunpack.i.h.bf16 %v2588_v1  ;;  %v1560_v56 = vpack.c.bf16 %v1468_v7, %v1464_v9 }
 0x2f8   : > { %1623 = vmatpush2.bf16.msra.mxu0 %v1562_v60  ;;  %1662 = vmatpush2.bf16.msra.mxu1 %v1593_v50  ;;  %v2494_v50 = vunpack.i.l.bf16 %v3963_v62  ;;  %v1455_v39 = vsel %vm1445_vm13, %v2570_v52, %v2574_v11  ;;  %v1457_v57 = vsel %vm1445_vm13, %v2575_v3, %v2579_v40  ;;  %v1456_v37 = vsel %vm1445_vm13, %v2574_v11, %v2575_v3 }
 0x2f9   : > { %v2583_v26 = vpop.permute.xlu1 %2582  ;;  %v4204_v31 = vpop.permute.xlu0 %2602  ;;  %1624 = vmatprep.subr.bf16.mxu0 %v1559_v13  ;;  %1663 = vmatprep.subr.bf16.mxu1 %v1565_v6  ;;  %v1454_v6 = vsel %vm1445_vm13, %v2590_v46, %v2570_v52 }
 0x2fa   : > { %v2585_v5 = vunpack.i.h.bf16 %v2583_v26  ;;  %v2584_v38 = vunpack.i.l.bf16 %v2583_v26  ;;  %v2605_v36 = vunpack.i.h.bf16 %v4204_v31  ;;  %v2604_v26 = vunpack.i.l.bf16 %v4204_v31 }
 0x2fb   : > { %v1874_v22 = vsel %vm1873_vm15, %v2494_v50, %v2495_v16 }
 0x2fc   : > { %1625 = vmatpush2.bf16.msra.mxu0 %v1558_v25  ;;  %1664 = vmatpush2.bf16.msra.mxu1 %v1564_v55  ;;  %v1459_v43 = vsel %vm1445_vm13, %v2580_v28, %v2584_v38  ;;  %v1461_v29 = vsel %vm1445_vm13, %v2585_v5, %v2589_v51  ;;  %v1460_v1 = vsel %vm1445_vm13, %v2584_v38, %v2585_v5 }
 0x2fd   : > { %v2593_v35 = vpop.permute.xlu1 %2592  ;;  %v2613_v59 = vpop.permute.xlu0 %2612  ;;  %1665 = vmatprep.subr.bf16.mxu1 %v1561_v58  ;;  %v1555_v53 = vpack.c.bf16 %v1459_v43, %v1455_v39  ;;  %v1557_v13 = vpack.c.bf16 %v1461_v29, %v1457_v57  ;;  %v1556_v44 = vpack.c.bf16 %v1460_v1, %v1456_v37 }
 0x2fe   : > { %v2594_v60 = vunpack.i.l.bf16 %v2593_v35  ;;  %v2595_v41 = vunpack.i.h.bf16 %v2593_v35  ;;  %v2615_v45 = vunpack.i.h.bf16 %v2613_v59  ;;  %v2614_v47 = vunpack.i.l.bf16 %v2613_v59 }
 0x2ff   : > { %1626 = vmatprep.subr.bf16.mxu0 %v1555_v53  ;;  %v2499_v35 = vunpack.i.l.bf16 %v3930_v12  ;;  %v1852_v59 = vsel %vm1445_vm13, %v2484_v32, %v2485_v48 }
 0x300   : > { %v1458_v55 = vsel %vm1445_vm13, %v2594_v60, %v2580_v28  ;;  %1666 = vmatpush2.bf16.msra.mxu1 %v1560_v56  ;;  %v1446_v11 = vsel %vm1445_vm13, %v2505_v61, %v2595_v41  ;;  %v1452_v52 = vsel %vm1445_vm13, %v2614_v47, %v2615_v45  ;;  %v1447_v28 = vsel %vm1445_vm13, %v2595_v41, %v2479_v19 }
 0x301   : > { %v1554_v20 = vpack.c.bf16 %v1458_v55, %v1454_v6  ;;  %v2598_v25 = vpop.permute.xlu1 %2597  ;;  %v2618_v5 = vpop.permute.xlu0 %2617  ;;  %1667 = vmatprep.subr.bf16.mxu1 %v1557_v13  ;;  %v1453_v3 = vsel %vm1445_vm13, %v2615_v45, %v2504_v54  ;;  %v1552_v14 = vpack.c.bf16 %v1452_v52, %v4089_v0  ;;  %v1875_v0 = vsel %vm1873_vm15, %v2495_v16, %v2499_v35 }
 0x302   : > { %v2600_v38 = vunpack.i.h.bf16 %v2598_v25  ;;  %v2599_v7 = vunpack.i.l.bf16 %v2598_v25  ;;  %v2620_v51 = vunpack.i.h.bf16 %v2618_v5  ;;  %v2619_v24 = vunpack.i.l.bf16 %v2618_v5 }
 0x303   : > { %1627 = vmatpush2.bf16.msra.mxu0 %v1554_v20  ;;  %v1860_v4 = vmax.f32 %v1838_v10, %v1852_v59  ;;  %v1876_v62 = vsel %vm1873_vm15, %v2499_v35, %v2500_v17  ;;  %v4619_v20 = vld [vmem:[#allocation7_spill] sm:$0xff] }
 0x304   : > { %v1851_v31 = vsel %vm1445_vm13, %v2620_v51, %v2484_v32  ;;  %v1450_v58 = vsel %vm1445_vm13, %v2619_v24, %v2600_v38  ;;  %1668 = vmatpush2.bf16.msra.mxu1 %v1556_v44  ;;  %v1451_v40 = vsel %vm1445_vm13, %v2600_v38, %v2614_v47  ;;  %v1449_v46 = vsel %vm1445_vm13, %v2480_v63, %v2599_v7  ;;  %v4615_v47 = vld [vmem:[#allocation5_spill] sm:$0xff] }
 0x305   : > { %v1550_v39 = vpack.c.bf16 %v1450_v58, %v1446_v11  ;;  %v1859_v19 = vmax.f32 %v1837_v15, %v1851_v31  ;;  %v1872_v43 = vpop.permute.xlu1 %1871  ;;  %v1551_v61 = vpack.c.bf16 %v1451_v40, %v1447_v28  ;;  %v1553_v9 = vpack.c.bf16 %v1453_v3, %v1449_v46  ;;  %v1895_v16 = vpop.permute.xlu0 %1894 }
 0x306   : > { %v1861_v15 = vmax.f32 %v1839_v33, %v4154_v21  ;;  %v1897_v63 = vsel %vm1896_vm14, %v2604_v26, %v2605_v36  ;;  %v1877_v48 = vsel %vm1873_vm15, %v2500_v17, %v1872_v43  ;;  %v1883_v50 = vmax.f32 %v1860_v4, %v1875_v0 }
 0x307   : > { %1628 = vmatprep.subr.bf16.mxu0 %v1551_v61  ;;  %1669 = vmatprep.subr.bf16.mxu1 %v1553_v9  ;;  %v1882_v34 = vmax.f32 %v1859_v19, %v1874_v22  ;;  %v1885_v21 = vmax.f32 %v1862_v23, %v1877_v48  ;;  %v4612_v17 = vmov 0  }
 0x308   : > { %1629 = vmatpush2.bf16.msra.mxu0 %v1550_v39  ;;  %1670 = vmatpush2.bf16.msra.mxu1 %v1552_v14  ;;  %v1884_v53 = vmax.f32 %v1861_v15, %v1876_v62 }
 0x309   : > { %v2608_v2 = vpop.permute.xlu1 %2607  ;;  %v1905_v30 = vmax.f32 %v1882_v34, %v1897_v63 }
 0x30a   : > { %v2610_v33 = vunpack.i.h.bf16 %v2608_v2  ;;  %v2609_v32 = vunpack.i.l.bf16 %v2608_v2 }
 0x30b   : > { %1631 = vmatmul.mubr.bf16.vlgmr.msra.gmra.mxu0 %v4069_v49  ;;  %1672 = vmatmul.mubr.bf16.vlgmr.msra.gmra.mxu1 %v4069_v49  ;;  %v1909_v42 = vsel %vm569_vm4, %v1905_v30, 0.0  ;;  %vm4616_vm4 = vcmp.eq.s32.totalorder %v4615_v47, 1 }
 0x30c   : > { %v1898_v27 = vsel %vm1896_vm14, %v2605_v36, %v2609_v32  ;;  %v1899_v18 = vsel %vm1896_vm14, %v2609_v32, %v2610_v33  ;;  %v1900_v12 = vsel %vm1896_vm14, %v2610_v33, %v1895_v16  ;;  %1971 = vmatprep.mubr.bf16.mxu0 %v4612_v17  ;;  %2012 = vmatprep.mubr.bf16.mxu1 %v4612_v17  ;;  %v1917_v36 = vld [vmem:[%s4323_s8] sm:$0xf] }
 0x30d   : > { %v1906_v8 = vmax.f32 %v1883_v50, %v1898_v27  ;;  %v1907_v56 = vmax.f32 %v1884_v53, %v1899_v18  ;;  %v1908_v1 = vmax.f32 %v1885_v21, %v1900_v12  ;;  %v1913_v60 = vpack.c.bf16 %v1909_v42, %v1909_v42 }
 0x30f   : > { %v1910_v49 = vsel %vm570_vm5, %v1906_v8, 0.0  ;;  %v1912_v45 = vsel %vm572_vm7, %v1908_v1, 0.0  ;;  %v1911_v13 = vsel %vm4616_vm4, %v1907_v56, 0.0  ;;  %v1928_v55 = vsel %vm421_vm1, %v1913_v60, 0 }
 0x310   : > { %v1914_v54 = vpack.c.bf16 %v1910_v49, %v1910_v49  ;;  %v1916_v37 = vpack.c.bf16 %v1912_v45, %v1912_v45  ;;  %v1915_v6 = vpack.c.bf16 %v1911_v13, %v1911_v13  ;;  %vm4617_vm5 = vcmask 64512  }
 0x311   : > { %vm4618_vm7 = vmmov %vm4617_vm5 }
 0x312   : > { %2116 = vmatprep.subr.msk.bf16.mxu0 %vm421_vm1, %v1914_v54  ;;  %2118 = vmatprep.subr.msk.bf16.mxu1 %vm421_vm1, %v1916_v37  ;;  %v1934_v44 = vsel %vm421_vm1, %v1915_v6, 0  ;;  %v1922_v30 = vpop.permute.xlu0 %1921 }
 0x313   : > { %1954 = vmatpush1.bf16.msra.mxu0 %v1928_v55  ;;  %1995 = vmatpush1.bf16.msra.mxu1 %v1934_v44 }
 0x316   : > { %2117 = vmatmul.mubr.msk.bf16.vlgmr.msra.gmra.mxu0 %vm4617_vm5, %v1917_v36  ;;  %2119 = vmatmul.mubr.msk.bf16.vlgmr.msra.gmra.mxu1 %vm4618_vm7, %v1917_v36  ;;  %v1575_v19 = vpop.permute.xlu1 %1574 }
 0x393   : > { %v972_v26 = vpop.f32.mrf.mxu0 }
 0x394   : > { %v973_v25 = vadd.f32 %v972_v26, %v4619_v20 }
 0x395   : > { %v974_v5 = vpop.f32.mrf.mxu0 }
 0x396   : > { %v1020_v38 = vmax.f32 %v973_v25, 0.0  ;;  %v975_v7 = vadd.f32 %v974_v5, %v4619_v20 }
 0x397   : > { %v1013_v51 = vpop.f32.mrf.mxu1  ;;  %v976_v24 = vpop.f32.mrf.mxu0 }
 0x398   : > { %1024 = vst [vmem:[%s2729_s23 + $0x20] sm:$0xff] %v1020_v38  ;;  %v1021_v11 = vmax.f32 %v975_v7, 0.0  ;;  %v1014_v52 = vadd.f32 %v1013_v51, %v4619_v20 }
 0x399   : > { %v1015_v28 = vpop.f32.mrf.mxu1  ;;  %v977_v3 = vpop.f32.mrf.mxu0 }
 0x39a   : > { %1025 = vst [vmem:[%s2729_s23 + $0x28] sm:$0xff] %v1021_v11  ;;  %v1022_v31 = vmax.f32 %v1014_v52, 0.0  ;;  %v1016_v58 = vadd.f32 %v1015_v28, %v4619_v20 }
 0x39b   : > { %v1017_v40 = vpop.f32.mrf.mxu1 }
 0x39c   : > { %1026 = vst [vmem:[%s2729_s23 + $0x30] sm:$0xff] %v1022_v31  ;;  %v1023_v46 = vmax.f32 %v1016_v58, 0.0 }
 0x39d   : > { %v1018_v39 = vpop.f32.mrf.mxu1 }
 0x39e   : > { %1027 = vst [vmem:[%s2729_s23 + $0x38] sm:$0xff] %v1023_v46 }
 0x3cb   : > { %v1632_v43 = vpop.f32.mrf.mxu0  ;;  %v1673_v61 = vpop.f32.mrf.mxu1 }
 0x3cc   : > { %v1633_v9 = vadd.f32 %v1632_v43, %v1575_v19  ;;  %v1674_v35 = vadd.f32 %v1673_v61, %v1575_v19 }
 0x3cd   : > { %v1634_v59 = vpop.f32.mrf.mxu0  ;;  %v1675_v14 = vpop.f32.mrf.mxu1 }
 0x3ce   : > { %v1680_v22 = vmax.f32 %v1633_v9, 0.0  ;;  %v1682_v10 = vmax.f32 %v1674_v35, 0.0  ;;  %v1635_v15 = vadd.f32 %v1634_v59, %v1575_v19  ;;  %v1676_v34 = vadd.f32 %v1675_v14, %v1575_v19 }
 0x3cf   : > { %v1636_v63 = vpop.f32.mrf.mxu0  ;;  %v1677_v0 = vpop.f32.mrf.mxu1 }
 0x3d0   : > { %1684 = vst [vmem:[%s2729_s23 + $0x40] sm:$0xff] %v1680_v22  ;;  %1686 = vst [vmem:[%s2729_s23 + $0x50] sm:$0xff] %v1682_v10  ;;  %v1681_v48 = vmax.f32 %v1635_v15, 0.0  ;;  %v1683_v4 = vmax.f32 %v1676_v34, 0.0 }
 0x3d1   : > { %v1637_v23 = vpop.f32.mrf.mxu0  ;;  %v1678_v2 = vpop.f32.mrf.mxu1 }
 0x3d2   : > { %1685 = vst [vmem:[%s2729_s23 + $0x48] sm:$0xff] %v1681_v48  ;;  %1687 = vst [vmem:[%s2729_s23 + $0x58] sm:$0xff] %v1683_v4 }
 0x3d6   : > { %v1973_v62 = vpop.f32.mrf.mxu0  ;;  %v2014_v33 = vpop.f32.mrf.mxu1 }
 0x3d7   : > { %v1974_v32 = vadd.f32 %v1973_v62, %v1922_v30  ;;  %v2015_v21 = vadd.f32 %v2014_v33, %v1922_v30 }
 0x3d8   : > { %v1975_v16 = vpop.f32.mrf.mxu0  ;;  %v2016_v50 = vpop.f32.mrf.mxu1 }
 0x3d9   : > { %v2021_v53 = vmax.f32 %v1974_v32, 0.0  ;;  %v2023_v29 = vmax.f32 %v2015_v21, 0.0  ;;  %v1976_v42 = vadd.f32 %v1975_v16, %v1922_v30  ;;  %v2017_v27 = vadd.f32 %v2016_v50, %v1922_v30 }
 0x3da   : > { %v1977_v18 = vpop.f32.mrf.mxu0  ;;  %v2018_v12 = vpop.f32.mrf.mxu1 }
 0x3db   : > { %2025 = vst [vmem:[%s2729_s23 + $0x60] sm:$0xff] %v2021_v53  ;;  %2027 = vst [vmem:[%s2729_s23 + $0x70] sm:$0xff] %v2023_v29  ;;  %v2022_v17 = vmax.f32 %v1976_v42, 0.0  ;;  %v2024_v8 = vmax.f32 %v2017_v27, 0.0 }
 0x3dc   : > { %v1978_v56 = vpop.f32.mrf.mxu0  ;;  %v2019_v1 = vpop.f32.mrf.mxu1 }
 0x3dd   : > { %2026 = vst [vmem:[%s2729_s23 + $0x68] sm:$0xff] %v2022_v17  ;;  %2028 = vst [vmem:[%s2729_s23 + $0x78] sm:$0xff] %v2024_v8 }
 0x3de PF: > { %s20_s13 = sadd.s32 1, %s2636_s13  }
 0x3df   : > { %p17_p5 = scmp.ge.s32.totalorder %s20_s13, 4  }
 0x3e1   :  { %19 = sbr.rel (!%p17_p5) target bundleno = 1 (0x1), region = 94 }

</bundles_post_ra>
